<compile_context>
chip_gen: v7x
topology: tpu7x:2x2x1
jax: 0.10.0
libtpu: 0.0.40
codegen_flags: <defaults>
</compile_context>

<pallas_src>
import functools

import jax
import jax.numpy as jnp
from jax.experimental import pallas as pl
from jax.experimental.pallas import tpu as pltpu

EMB = 32   # emd_dim
ZU = 24    # Zu width
ZC = 8     # Zc width (input of condition classifier)

# Row indices inside the packed [18, 128] bias/gamma/beta slab.
(B1, G1, BE1, B2, B3, G2, BE2,
 BB1, GB1, BEB1, BB2, GB2, BEB2, BB3,
 BC1, GC, BEC, BC2) = range(18)


# --------------------------------------------------------------------------
# Kernel
# --------------------------------------------------------------------------
def model_fwd_kernel(
    # activations
    x_ref, w1br_ref, w3br_ref, eps_ref,
    # packed small vectors
    vec_ref,
    # weights (output dims zero-padded to 128 / Fp)
    w1x_ref, w2_ref, w3z_ref, w4_ref, b4_ref,
    wb1_ref, wb2_ref, wb3_ref, wc1_ref, wc2_ref,
    # outputs (all lane-dense)
    batch_ref, cond_ref, dec_ref, zslab_ref,
):
    f32 = jnp.float32

    def vrow(i):                       # (1, 128) static row of the vector slab
        return vec_ref[i:i + 1, :]

    def bn_relu(h, gamma, beta, eps=1e-5):
        # Fused one-pass batch statistics (biased variance, training mode).
        inv_n = 1.0 / h.shape[0]
        s1 = jnp.sum(h, axis=0, keepdims=True)
        s2 = jnp.sum(h * h, axis=0, keepdims=True)
        mu = s1 * inv_n
        var = jnp.maximum(s2 * inv_n - mu * mu, 0.0)
        hn = (h - mu) * jax.lax.rsqrt(var + eps) * gamma + beta
        return jnp.maximum(hn, 0.0)

    def softmax(s):
        e = jnp.exp(s - jnp.max(s, axis=1, keepdims=True))
        return e * pl.reciprocal(jnp.sum(e, axis=1, keepdims=True))

    x = x_ref[...]
    eps = eps_ref[...]

    # ---------------- encoder ----------------
    h1 = (jnp.dot(x, w1x_ref[...], preferred_element_type=f32)
          + w1br_ref[...] + vrow(B1))
    h1 = bn_relu(h1, vrow(G1), vrow(BE1))
    zp = jnp.dot(h1, w2_ref[...], preferred_element_type=f32) + vrow(B2)
    # zp lanes: [0:32]=mean, [32:64]=log_var, [64:128]=0 (zero-padded weights)

    mean = zp[:, :EMB]
    log_var = zp[:, EMB:2 * EMB]
    z = mean + eps * jnp.exp(0.5 * log_var)
    zc = z[:, ZU:]

    # ---------------- decoder ----------------
    h2 = (jnp.dot(z, w3z_ref[...], preferred_element_type=f32)
          + w3br_ref[...] + vrow(B3))
    h2 = bn_relu(h2, vrow(G2), vrow(BE2))
    dec_ref[...] = jnp.tanh(
        jnp.dot(h2, w4_ref[...], preferred_element_type=f32) + b4_ref[...])

    # ------ batch classifier (gradient reversal == identity in forward) ------
    hb = jnp.dot(z, wb1_ref[...], preferred_element_type=f32) + vrow(BB1)
    hb = bn_relu(hb, vrow(GB1), vrow(BEB1))
    hb = jnp.dot(hb, wb2_ref[...], preferred_element_type=f32) + vrow(BB2)
    hb = bn_relu(hb, vrow(GB2), vrow(BEB2))
    batch_ref[...] = softmax(
        jnp.dot(hb, wb3_ref[...], preferred_element_type=f32) + vrow(BB3))

    # ---------------- condition classifier on Zc ----------------
    hc = jnp.dot(zc, wc1_ref[...], preferred_element_type=f32) + vrow(BC1)
    hc = bn_relu(hc, vrow(GC), vrow(BEC))
    cond_ref[...] = softmax(
        jnp.dot(hc, wc2_ref[...], preferred_element_type=f32) + vrow(BC2))

    # --------------- packed z slab: [mean | log_var | z | 0] ----------------
    zslab_ref[...] = zp                       # cols 0:64 = mean|log_var, 64:128 = 0
    zslab_ref[:, 2 * EMB:3 * EMB] = z         # overwrite cols 64:96 with z


# --------------------------------------------------------------------------
# Parameters (PyTorch-shaped) and packing into kernel-friendly slabs
# --------------------------------------------------------------------------
def init_params(key, num_features, num_batches, num_conditions):
    """Deterministic synthetic parameter init (shapes match the PyTorch module)."""
    ks = iter(jax.random.split(key, 32))
    f32 = jnp.float32

    def lin(k, fan_in, fan_out, scale=0.1):
        kw, kb = jax.random.split(k)
        w = scale * jax.random.normal(kw, (fan_in, fan_out), f32)
        b = scale * jax.random.normal(kb, (1, fan_out), f32)
        return w, b

    p = {}
    # encoder: Linear(F+NB,128) split into x / batch-one-hot parts
    w1, b1 = lin(next(ks), num_features + num_batches, 128)
    p["w1x"], p["w1b"], p["b1"] = w1[:num_features], w1[num_features:], b1
    p["g1"] = jnp.ones((1, 128), f32)
    p["be1"] = jnp.zeros((1, 128), f32)
    p["w2"], p["b2"] = lin(next(ks), 128, EMB * 2)

    # decoder: Linear(32+NB,128) split into z / batch-one-hot parts
    w3, b3 = lin(next(ks), EMB + num_batches, 128)
    p["w3z"], p["w3b"], p["b3"] = w3[:EMB], w3[EMB:], b3
    p["g2"] = jnp.ones((1, 128), f32)
    p["be2"] = jnp.zeros((1, 128), f32)
    p["w4"], p["b4"] = lin(next(ks), 128, num_features)

    # batch classifier
    p["wb1"], p["bb1"] = lin(next(ks), EMB, 100)
    p["gb1"] = jnp.ones((1, 100), f32)
    p["beb1"] = jnp.zeros((1, 100), f32)
    p["wb2"], p["bb2"] = lin(next(ks), 100, 100)
    p["gb2"] = jnp.ones((1, 100), f32)
    p["beb2"] = jnp.zeros((1, 100), f32)
    p["wb3"], p["bb3"] = lin(next(ks), 100, num_batches)

    # condition classifier (input dim hard-coded to 8 == ZC in the module)
    p["wc1"], p["bc1"] = lin(next(ks), ZC, 50)
    p["gc"] = jnp.ones((1, 50), f32)
    p["bec"] = jnp.zeros((1, 50), f32)
    p["wc2"], p["bc2"] = lin(next(ks), 50, num_conditions)
    return p


def pack_params(p, num_features, num_batches, num_conditions):
    """Pad/pack PyTorch-shaped params into lane-dense slabs (done once)."""
    f32 = jnp.float32
    NEG = -1e30   # pad value for logit biases: exp(-1e30 - max) underflows to 0

    def padc(a, width=128, fill=0.0):     # pad last dim to `width`
        a = a.astype(f32)
        pad = width - a.shape[-1]
        if pad == 0:
            return a
        return jnp.concatenate(
            [a, jnp.full(a.shape[:-1] + (pad,), fill, f32)], axis=-1)

    def padr(a, rows):                    # pad first dim with zero rows
        a = a.astype(f32)
        pad = rows - a.shape[0]
        if pad == 0:
            return a
        return jnp.concatenate([a, jnp.zeros((pad,) + a.shape[1:], f32)], axis=0)

    Fp = ((num_features + 127) // 128) * 128

    rows = [None] * 18
    rows[B1], rows[G1], rows[BE1] = p["b1"], p["g1"], p["be1"]
    rows[B2] = padc(p["b2"])
    rows[B3], rows[G2], rows[BE2] = p["b3"], p["g2"], p["be2"]
    rows[BB1], rows[GB1], rows[BEB1] = padc(p["bb1"]), padc(p["gb1"]), padc(p["beb1"])
    rows[BB2], rows[GB2], rows[BEB2] = padc(p["bb2"]), padc(p["gb2"]), padc(p["beb2"])
    rows[BB3] = padc(p["bb3"], fill=NEG)
    rows[BC1], rows[GC], rows[BEC] = padc(p["bc1"]), padc(p["gc"]), padc(p["bec"])
    rows[BC2] = padc(p["bc2"], fill=NEG)
    vec_slab = jnp.concatenate([r.reshape(1, 128).astype(f32) for r in rows], axis=0)

    return dict(
        vec_slab=vec_slab,
        w1x=p["w1x"].astype(f32),
        w1b=p["w1b"].astype(f32),     # gathered per-row in the wrapper
        w3z=p["w3z"].astype(f32),
        w3b=p["w3b"].astype(f32),     # gathered per-row in the wrapper
        w2p=padc(p["w2"]),                       # (128, 128)
        w4p=padc(p["w4"], width=Fp),             # (128, Fp)
        b4p=padc(p["b4"], width=Fp),             # (1, Fp)
        wb1p=padc(p["wb1"]),                     # (32, 128)
        wb2p=padr(padc(p["wb2"]), 128),          # (128, 128)
        wb3p=padr(padc(p["wb3"]), 128),          # (128, 128)
        wc1p=padc(p["wc1"]),                     # (8, 128)
        wc2p=padr(padc(p["wc2"]), 128),          # (128, 128)
    )


# --------------------------------------------------------------------------
# Wrapper
# --------------------------------------------------------------------------
@functools.partial(
    jax.jit, static_argnames=("num_features", "num_batches", "num_conditions"))
def model_forward(packed, x, b, eps, *, num_features, num_batches, num_conditions):
    """x: [N,F] f32, b: [N] int32 batch id, eps: [N,32] N(0,1) noise."""
    N = x.shape[0]
    Fp = packed["w4p"].shape[1]
    f32 = jnp.float32

    # one_hot(b) @ W  ==  row gather (XLA glue, outside the kernel)
    w1b_rows = jnp.take(packed["w1b"], b, axis=0)   # [N, 128]
    w3b_rows = jnp.take(packed["w3b"], b, axis=0)   # [N, 128]

    inputs = (
        x.astype(f32), w1b_rows, w3b_rows, eps.astype(f32), packed["vec_slab"],
        packed["w1x"], packed["w2p"], packed["w3z"], packed["w4p"], packed["b4p"],
        packed["wb1p"], packed["wb2p"], packed["wb3p"],
        packed["wc1p"], packed["wc2p"],
    )

    vmem = pl.BlockSpec(memory_space=pltpu.MemorySpace.VMEM)
    out_shape = (
        jax.ShapeDtypeStruct((N, 128), f32),   # batch softmax (padded to 128)
        jax.ShapeDtypeStruct((N, 128), f32),   # cond softmax (padded to 128)
        jax.ShapeDtypeStruct((N, Fp), f32),    # decoder output (padded to Fp)
        jax.ShapeDtypeStruct((N, 128), f32),   # [mean | log_var | z | 0]
    )

    batch_pad, cond_pad, dec_pad, zslab = pl.pallas_call(
        model_fwd_kernel,
        out_shape=out_shape,
        in_specs=[vmem] * len(inputs),
        out_specs=tuple(vmem for _ in out_shape),
    )(*inputs)

    batch_out = batch_pad[:, :num_batches]
    cond_out = cond_pad[:, :num_conditions]
    dec_out = dec_pad[:, :num_features]
    mean = zslab[:, :EMB]
    log_var = zslab[:, EMB:2 * EMB]
    z = zslab[:, 2 * EMB:3 * EMB]
    zu = z[:, :ZU]
    zc = z[:, ZU:]
    return batch_out, cond_out, dec_out, z, mean, log_var, zu, zc


# --------------------------------------------------------------------------
# Pure-JAX reference (for a loose numerical sanity check)
# --------------------------------------------------------------------------
def reference_forward(p, x, b, eps, num_batches):
    bh = jax.nn.one_hot(b, num_batches, dtype=jnp.float32)

    def bn(h, g, be):
        mu = jnp.mean(h, axis=0, keepdims=True)
        var = jnp.mean((h - mu) ** 2, axis=0, keepdims=True)
        return (h - mu) / jnp.sqrt(var + 1e-5) * g + be

    h1 = x @ p["w1x"] + bh @ p["w1b"] + p["b1"]
    h1 = jax.nn.relu(bn(h1, p["g1"], p["be1"]))
    zp = h1 @ p["w2"] + p["b2"]
    mean, log_var = zp[:, :EMB], zp[:, EMB:]
    z = mean + eps * jnp.exp(0.5 * log_var)
    h2 = z @ p["w3z"] + bh @ p["w3b"] + p["b3"]
    h2 = jax.nn.relu(bn(h2, p["g2"], p["be2"]))
    dec = jnp.tanh(h2 @ p["w4"] + p["b4"])
    hb = z @ p["wb1"] + p["bb1"]
    hb = jax.nn.relu(bn(hb, p["gb1"], p["beb1"]))
    hb = hb @ p["wb2"] + p["bb2"]
    hb = jax.nn.relu(bn(hb, p["gb2"], p["beb2"]))
    batch_out = jax.nn.softmax(hb @ p["wb3"] + p["bb3"], axis=1)
    zc = z[:, ZU:]
    hc = zc @ p["wc1"] + p["bc1"]
    hc = jax.nn.relu(bn(hc, p["gc"], p["bec"]))
    cond_out = jax.nn.softmax(hc @ p["wc2"] + p["bc2"], axis=1)
    return batch_out, cond_out, dec, z, mean, log_var, z[:, :ZU], zc


# --------------------------------------------------------------------------
if __name__ == "__main__":
    N = 8                  # batch size (multiple of 8 sublanes; BN needs N > 1)
    num_features = 16
    num_batches = 4
    num_conditions = 3

    key = jax.random.PRNGKey(0)
    k_param, k_x, k_b, k_eps = jax.random.split(key, 4)

    params = init_params(k_param, num_features, num_batches, num_conditions)
    packed = pack_params(params, num_features, num_batches, num_conditions)

    x = jax.random.normal(k_x, (N, num_features), jnp.float32)
    b = jax.random.randint(k_b, (N,), 0, num_batches, jnp.int32)
    eps = jax.random.normal(k_eps, (N, EMB), jnp.float32)   # reparameterization noise

    outs = model_forward(packed, x, b, eps,
                         num_features=num_features,
                         num_batches=num_batches,
                         num_conditions=num_conditions)
    outs = jax.block_until_ready(outs)

    batch_out, cond_out, dec_out, z, mean, log_var, zu, zc = outs
    assert batch_out.shape == (N, num_batches)
    assert cond_out.shape == (N, num_conditions)
    assert dec_out.shape == (N, num_features)
    assert z.shape == (N, EMB) and mean.shape == (N, EMB) and log_var.shape == (N, EMB)
    assert zu.shape == (N, ZU) and zc.shape == (N, ZC)
    assert jnp.allclose(jnp.sum(batch_out, axis=1), 1.0, atol=1e-5)
    assert jnp.allclose(jnp.sum(cond_out, axis=1), 1.0, atol=1e-5)

    # Loose numerical check vs. a pure-JAX reference (tolerance covers the
    # difference between MXU/XLA default matmul precisions and fused BN stats).
    refs = reference_forward(params, x, b, eps, num_batches)
    for got, want in zip(outs, refs):
        assert got.shape == want.shape
        assert bool(jnp.max(jnp.abs(got - want)) < 5e-2)

    print("KERNEL_OK")
</pallas_src>

<mosaic_0001>
module attributes {stable_mosaic.version = 11 : i64} {
  func.func @model_fwd_kernel(%arg0: memref<8x16xf32, #tpu.memory_space<vmem>>, %arg1: memref<8x128xf32, #tpu.memory_space<vmem>>, %arg2: memref<8x128xf32, #tpu.memory_space<vmem>>, %arg3: memref<8x32xf32, #tpu.memory_space<vmem>>, %arg4: memref<18x128xf32, #tpu.memory_space<vmem>>, %arg5: memref<16x128xf32, #tpu.memory_space<vmem>>, %arg6: memref<128x128xf32, #tpu.memory_space<vmem>>, %arg7: memref<32x128xf32, #tpu.memory_space<vmem>>, %arg8: memref<128x128xf32, #tpu.memory_space<vmem>>, %arg9: memref<1x128xf32, #tpu.memory_space<vmem>>, %arg10: memref<32x128xf32, #tpu.memory_space<vmem>>, %arg11: memref<128x128xf32, #tpu.memory_space<vmem>>, %arg12: memref<128x128xf32, #tpu.memory_space<vmem>>, %arg13: memref<8x128xf32, #tpu.memory_space<vmem>>, %arg14: memref<128x128xf32, #tpu.memory_space<vmem>>, %arg15: memref<8x128xf32, #tpu.memory_space<vmem>>, %arg16: memref<8x128xf32, #tpu.memory_space<vmem>>, %arg17: memref<8x128xf32, #tpu.memory_space<vmem>>, %arg18: memref<8x128xf32, #tpu.memory_space<vmem>>) attributes {dimension_semantics = [], scalar_prefetch = 0 : i64, scratch_operands = 0 : i64, tpu.core_type = #tpu.core_type<tc>} {
    %c0 = arith.constant 0 : index
    %c0_0 = arith.constant 0 : index
    %0 = vector.load %arg0[%c0, %c0_0] : memref<8x16xf32, #tpu.memory_space<vmem>>, vector<8x16xf32>
    %c0_1 = arith.constant 0 : index
    %c0_2 = arith.constant 0 : index
    %1 = vector.load %arg3[%c0_1, %c0_2] : memref<8x32xf32, #tpu.memory_space<vmem>>, vector<8x32xf32>
    %c0_3 = arith.constant 0 : index
    %c0_4 = arith.constant 0 : index
    %2 = vector.load %arg5[%c0_3, %c0_4] : memref<16x128xf32, #tpu.memory_space<vmem>>, vector<16x128xf32>
    %cst = arith.constant dense<0.000000e+00> : vector<8x128xf32>
    %3 = tpu.matmul %0, %2, %cst {dimension_numbers = #tpu.dot_dimension_numbers<[1], [0], [0], [1], [0, 0, 1, 1], [], []>} : vector<8x16xf32>, vector<16x128xf32>, vector<8x128xf32> -> vector<8x128xf32>
    %c0_5 = arith.constant 0 : index
    %c0_6 = arith.constant 0 : index
    %4 = vector.load %arg1[%c0_5, %c0_6] : memref<8x128xf32, #tpu.memory_space<vmem>>, vector<8x128xf32>
    %5 = arith.addf %3, %4 : vector<8x128xf32>
    %c0_7 = arith.constant 0 : index
    %c0_8 = arith.constant 0 : index
    %6 = vector.load %arg4[%c0_7, %c0_8] : memref<18x128xf32, #tpu.memory_space<vmem>>, vector<1x128xf32>
    %7 = vector.broadcast %6 : vector<1x128xf32> to vector<8x128xf32>
    %8 = arith.addf %5, %7 : vector<8x128xf32>
    %c1 = arith.constant 1 : index
    %c0_9 = arith.constant 0 : index
    %9 = vector.load %arg4[%c1, %c0_9] : memref<18x128xf32, #tpu.memory_space<vmem>>, vector<1x128xf32>
    %c2 = arith.constant 2 : index
    %c0_10 = arith.constant 0 : index
    %10 = vector.load %arg4[%c2, %c0_10] : memref<18x128xf32, #tpu.memory_space<vmem>>, vector<1x128xf32>
    %cst_11 = arith.constant dense<0.000000e+00> : vector<128xf32>
    %11 = vector.multi_reduction <add>, %8, %cst_11 [0] : vector<8x128xf32> to vector<128xf32>
    %12 = vector.shape_cast %11 : vector<128xf32> to vector<1x128xf32>
    %13 = arith.mulf %8, %8 : vector<8x128xf32>
    %cst_12 = arith.constant dense<0.000000e+00> : vector<128xf32>
    %14 = vector.multi_reduction <add>, %13, %cst_12 [0] : vector<8x128xf32> to vector<128xf32>
    %15 = vector.shape_cast %14 : vector<128xf32> to vector<1x128xf32>
    %cst_13 = arith.constant 1.250000e-01 : f32
    %16 = vector.broadcast %cst_13 : f32 to vector<1x128xf32>
    %17 = arith.mulf %12, %16 : vector<1x128xf32>
    %cst_14 = arith.constant 1.250000e-01 : f32
    %18 = vector.broadcast %cst_14 : f32 to vector<1x128xf32>
    %19 = arith.mulf %15, %18 : vector<1x128xf32>
    %20 = arith.mulf %17, %17 : vector<1x128xf32>
    %21 = arith.subf %19, %20 : vector<1x128xf32>
    %cst_15 = arith.constant 0.000000e+00 : f32
    %22 = vector.broadcast %cst_15 : f32 to vector<1x128xf32>
    %23 = arith.maximumf %21, %22 : vector<1x128xf32>
    %24 = vector.broadcast %17 : vector<1x128xf32> to vector<8x128xf32>
    %25 = arith.subf %8, %24 : vector<8x128xf32>
    %cst_16 = arith.constant 9.99999974E-6 : f32
    %26 = vector.broadcast %cst_16 : f32 to vector<1x128xf32>
    %27 = arith.addf %23, %26 : vector<1x128xf32>
    %28 = math.rsqrt %27 : vector<1x128xf32>
    %29 = vector.broadcast %28 : vector<1x128xf32> to vector<8x128xf32>
    %30 = arith.mulf %25, %29 : vector<8x128xf32>
    %31 = vector.broadcast %9 : vector<1x128xf32> to vector<8x128xf32>
    %32 = arith.mulf %30, %31 : vector<8x128xf32>
    %33 = vector.broadcast %10 : vector<1x128xf32> to vector<8x128xf32>
    %34 = arith.addf %32, %33 : vector<8x128xf32>
    %cst_17 = arith.constant 0.000000e+00 : f32
    %35 = vector.broadcast %cst_17 : f32 to vector<8x128xf32>
    %36 = arith.maximumf %34, %35 : vector<8x128xf32>
    %c0_18 = arith.constant 0 : index
    %c0_19 = arith.constant 0 : index
    %37 = vector.load %arg6[%c0_18, %c0_19] : memref<128x128xf32, #tpu.memory_space<vmem>>, vector<128x128xf32>
    %cst_20 = arith.constant dense<0.000000e+00> : vector<8x128xf32>
    %38 = tpu.matmul %36, %37, %cst_20 {dimension_numbers = #tpu.dot_dimension_numbers<[1], [0], [0], [1], [0, 0, 1, 1], [], []>} : vector<8x128xf32>, vector<128x128xf32>, vector<8x128xf32> -> vector<8x128xf32>
    %c3 = arith.constant 3 : index
    %c0_21 = arith.constant 0 : index
    %39 = vector.load %arg4[%c3, %c0_21] : memref<18x128xf32, #tpu.memory_space<vmem>>, vector<1x128xf32>
    %40 = vector.broadcast %39 : vector<1x128xf32> to vector<8x128xf32>
    %41 = arith.addf %38, %40 : vector<8x128xf32>
    %42 = vector.extract_strided_slice %41 {offsets = [0, 0], sizes = [8, 32], strides = [1, 1]} : vector<8x128xf32> to vector<8x32xf32>
    %43 = vector.extract_strided_slice %41 {offsets = [0, 32], sizes = [8, 32], strides = [1, 1]} : vector<8x128xf32> to vector<8x32xf32>
    %cst_22 = arith.constant 5.000000e-01 : f32
    %44 = vector.broadcast %cst_22 : f32 to vector<8x32xf32>
    %45 = arith.mulf %44, %43 : vector<8x32xf32>
    %46 = math.exp %45 : vector<8x32xf32>
    %47 = arith.mulf %1, %46 : vector<8x32xf32>
    %48 = arith.addf %42, %47 : vector<8x32xf32>
    %49 = vector.extract_strided_slice %48 {offsets = [0, 24], sizes = [8, 8], strides = [1, 1]} : vector<8x32xf32> to vector<8x8xf32>
    %c0_23 = arith.constant 0 : index
    %c0_24 = arith.constant 0 : index
    %50 = vector.load %arg7[%c0_23, %c0_24] : memref<32x128xf32, #tpu.memory_space<vmem>>, vector<32x128xf32>
    %cst_25 = arith.constant dense<0.000000e+00> : vector<8x128xf32>
    %51 = tpu.matmul %48, %50, %cst_25 {dimension_numbers = #tpu.dot_dimension_numbers<[1], [0], [0], [1], [0, 0, 1, 1], [], []>} : vector<8x32xf32>, vector<32x128xf32>, vector<8x128xf32> -> vector<8x128xf32>
    %c0_26 = arith.constant 0 : index
    %c0_27 = arith.constant 0 : index
    %52 = vector.load %arg2[%c0_26, %c0_27] : memref<8x128xf32, #tpu.memory_space<vmem>>, vector<8x128xf32>
    %53 = arith.addf %51, %52 : vector<8x128xf32>
    %c4 = arith.constant 4 : index
    %c0_28 = arith.constant 0 : index
    %54 = vector.load %arg4[%c4, %c0_28] : memref<18x128xf32, #tpu.memory_space<vmem>>, vector<1x128xf32>
    %55 = vector.broadcast %54 : vector<1x128xf32> to vector<8x128xf32>
    %56 = arith.addf %53, %55 : vector<8x128xf32>
    %c5 = arith.constant 5 : index
    %c0_29 = arith.constant 0 : index
    %57 = vector.load %arg4[%c5, %c0_29] : memref<18x128xf32, #tpu.memory_space<vmem>>, vector<1x128xf32>
    %c6 = arith.constant 6 : index
    %c0_30 = arith.constant 0 : index
    %58 = vector.load %arg4[%c6, %c0_30] : memref<18x128xf32, #tpu.memory_space<vmem>>, vector<1x128xf32>
    %cst_31 = arith.constant dense<0.000000e+00> : vector<128xf32>
    %59 = vector.multi_reduction <add>, %56, %cst_31 [0] : vector<8x128xf32> to vector<128xf32>
    %60 = vector.shape_cast %59 : vector<128xf32> to vector<1x128xf32>
    %61 = arith.mulf %56, %56 : vector<8x128xf32>
    %cst_32 = arith.constant dense<0.000000e+00> : vector<128xf32>
    %62 = vector.multi_reduction <add>, %61, %cst_32 [0] : vector<8x128xf32> to vector<128xf32>
    %63 = vector.shape_cast %62 : vector<128xf32> to vector<1x128xf32>
    %cst_33 = arith.constant 1.250000e-01 : f32
    %64 = vector.broadcast %cst_33 : f32 to vector<1x128xf32>
    %65 = arith.mulf %60, %64 : vector<1x128xf32>
    %cst_34 = arith.constant 1.250000e-01 : f32
    %66 = vector.broadcast %cst_34 : f32 to vector<1x128xf32>
    %67 = arith.mulf %63, %66 : vector<1x128xf32>
    %68 = arith.mulf %65, %65 : vector<1x128xf32>
    %69 = arith.subf %67, %68 : vector<1x128xf32>
    %cst_35 = arith.constant 0.000000e+00 : f32
    %70 = vector.broadcast %cst_35 : f32 to vector<1x128xf32>
    %71 = arith.maximumf %69, %70 : vector<1x128xf32>
    %72 = vector.broadcast %65 : vector<1x128xf32> to vector<8x128xf32>
    %73 = arith.subf %56, %72 : vector<8x128xf32>
    %cst_36 = arith.constant 9.99999974E-6 : f32
    %74 = vector.broadcast %cst_36 : f32 to vector<1x128xf32>
    %75 = arith.addf %71, %74 : vector<1x128xf32>
    %76 = math.rsqrt %75 : vector<1x128xf32>
    %77 = vector.broadcast %76 : vector<1x128xf32> to vector<8x128xf32>
    %78 = arith.mulf %73, %77 : vector<8x128xf32>
    %79 = vector.broadcast %57 : vector<1x128xf32> to vector<8x128xf32>
    %80 = arith.mulf %78, %79 : vector<8x128xf32>
    %81 = vector.broadcast %58 : vector<1x128xf32> to vector<8x128xf32>
    %82 = arith.addf %80, %81 : vector<8x128xf32>
    %cst_37 = arith.constant 0.000000e+00 : f32
    %83 = vector.broadcast %cst_37 : f32 to vector<8x128xf32>
    %84 = arith.maximumf %82, %83 : vector<8x128xf32>
    %c0_38 = arith.constant 0 : index
    %c0_39 = arith.constant 0 : index
    %85 = vector.load %arg8[%c0_38, %c0_39] : memref<128x128xf32, #tpu.memory_space<vmem>>, vector<128x128xf32>
    %cst_40 = arith.constant dense<0.000000e+00> : vector<8x128xf32>
    %86 = tpu.matmul %84, %85, %cst_40 {dimension_numbers = #tpu.dot_dimension_numbers<[1], [0], [0], [1], [0, 0, 1, 1], [], []>} : vector<8x128xf32>, vector<128x128xf32>, vector<8x128xf32> -> vector<8x128xf32>
    %c0_41 = arith.constant 0 : index
    %c0_42 = arith.constant 0 : index
    %87 = vector.load %arg9[%c0_41, %c0_42] : memref<1x128xf32, #tpu.memory_space<vmem>>, vector<1x128xf32>
    %88 = vector.broadcast %87 : vector<1x128xf32> to vector<8x128xf32>
    %89 = arith.addf %86, %88 : vector<8x128xf32>
    %90 = math.tanh %89 : vector<8x128xf32>
    %c0_43 = arith.constant 0 : index
    %c0_44 = arith.constant 0 : index
    %91 = vector.load %arg17[%c0_43, %c0_44] : memref<8x128xf32, #tpu.memory_space<vmem>>, vector<8x128xf32>
    tpu.vector_store %arg17[%c0_43, %c0_44], %90 {strides = array<i32>} : memref<8x128xf32, #tpu.memory_space<vmem>>, vector<8x128xf32>,
    %c0_45 = arith.constant 0 : index
    %c0_46 = arith.constant 0 : index
    %92 = vector.load %arg10[%c0_45, %c0_46] : memref<32x128xf32, #tpu.memory_space<vmem>>, vector<32x128xf32>
    %cst_47 = arith.constant dense<0.000000e+00> : vector<8x128xf32>
    %93 = tpu.matmul %48, %92, %cst_47 {dimension_numbers = #tpu.dot_dimension_numbers<[1], [0], [0], [1], [0, 0, 1, 1], [], []>} : vector<8x32xf32>, vector<32x128xf32>, vector<8x128xf32> -> vector<8x128xf32>
    %c7 = arith.constant 7 : index
    %c0_48 = arith.constant 0 : index
    %94 = vector.load %arg4[%c7, %c0_48] : memref<18x128xf32, #tpu.memory_space<vmem>>, vector<1x128xf32>
    %95 = vector.broadcast %94 : vector<1x128xf32> to vector<8x128xf32>
    %96 = arith.addf %93, %95 : vector<8x128xf32>
    %c8 = arith.constant 8 : index
    %c0_49 = arith.constant 0 : index
    %97 = vector.load %arg4[%c8, %c0_49] : memref<18x128xf32, #tpu.memory_space<vmem>>, vector<1x128xf32>
    %c9 = arith.constant 9 : index
    %c0_50 = arith.constant 0 : index
    %98 = vector.load %arg4[%c9, %c0_50] : memref<18x128xf32, #tpu.memory_space<vmem>>, vector<1x128xf32>
    %cst_51 = arith.constant dense<0.000000e+00> : vector<128xf32>
    %99 = vector.multi_reduction <add>, %96, %cst_51 [0] : vector<8x128xf32> to vector<128xf32>
    %100 = vector.shape_cast %99 : vector<128xf32> to vector<1x128xf32>
    %101 = arith.mulf %96, %96 : vector<8x128xf32>
    %cst_52 = arith.constant dense<0.000000e+00> : vector<128xf32>
    %102 = vector.multi_reduction <add>, %101, %cst_52 [0] : vector<8x128xf32> to vector<128xf32>
    %103 = vector.shape_cast %102 : vector<128xf32> to vector<1x128xf32>
    %cst_53 = arith.constant 1.250000e-01 : f32
    %104 = vector.broadcast %cst_53 : f32 to vector<1x128xf32>
    %105 = arith.mulf %100, %104 : vector<1x128xf32>
    %cst_54 = arith.constant 1.250000e-01 : f32
    %106 = vector.broadcast %cst_54 : f32 to vector<1x128xf32>
    %107 = arith.mulf %103, %106 : vector<1x128xf32>
    %108 = arith.mulf %105, %105 : vector<1x128xf32>
    %109 = arith.subf %107, %108 : vector<1x128xf32>
    %cst_55 = arith.constant 0.000000e+00 : f32
    %110 = vector.broadcast %cst_55 : f32 to vector<1x128xf32>
    %111 = arith.maximumf %109, %110 : vector<1x128xf32>
    %112 = vector.broadcast %105 : vector<1x128xf32> to vector<8x128xf32>
    %113 = arith.subf %96, %112 : vector<8x128xf32>
    %cst_56 = arith.constant 9.99999974E-6 : f32
    %114 = vector.broadcast %cst_56 : f32 to vector<1x128xf32>
    %115 = arith.addf %111, %114 : vector<1x128xf32>
    %116 = math.rsqrt %115 : vector<1x128xf32>
    %117 = vector.broadcast %116 : vector<1x128xf32> to vector<8x128xf32>
    %118 = arith.mulf %113, %117 : vector<8x128xf32>
    %119 = vector.broadcast %97 : vector<1x128xf32> to vector<8x128xf32>
    %120 = arith.mulf %118, %119 : vector<8x128xf32>
    %121 = vector.broadcast %98 : vector<1x128xf32> to vector<8x128xf32>
    %122 = arith.addf %120, %121 : vector<8x128xf32>
    %cst_57 = arith.constant 0.000000e+00 : f32
    %123 = vector.broadcast %cst_57 : f32 to vector<8x128xf32>
    %124 = arith.maximumf %122, %123 : vector<8x128xf32>
    %c0_58 = arith.constant 0 : index
    %c0_59 = arith.constant 0 : index
    %125 = vector.load %arg11[%c0_58, %c0_59] : memref<128x128xf32, #tpu.memory_space<vmem>>, vector<128x128xf32>
    %cst_60 = arith.constant dense<0.000000e+00> : vector<8x128xf32>
    %126 = tpu.matmul %124, %125, %cst_60 {dimension_numbers = #tpu.dot_dimension_numbers<[1], [0], [0], [1], [0, 0, 1, 1], [], []>} : vector<8x128xf32>, vector<128x128xf32>, vector<8x128xf32> -> vector<8x128xf32>
    %c10 = arith.constant 10 : index
    %c0_61 = arith.constant 0 : index
    %127 = vector.load %arg4[%c10, %c0_61] : memref<18x128xf32, #tpu.memory_space<vmem>>, vector<1x128xf32>
    %128 = vector.broadcast %127 : vector<1x128xf32> to vector<8x128xf32>
    %129 = arith.addf %126, %128 : vector<8x128xf32>
    %c11 = arith.constant 11 : index
    %c0_62 = arith.constant 0 : index
    %130 = vector.load %arg4[%c11, %c0_62] : memref<18x128xf32, #tpu.memory_space<vmem>>, vector<1x128xf32>
    %c12 = arith.constant 12 : index
    %c0_63 = arith.constant 0 : index
    %131 = vector.load %arg4[%c12, %c0_63] : memref<18x128xf32, #tpu.memory_space<vmem>>, vector<1x128xf32>
    %cst_64 = arith.constant dense<0.000000e+00> : vector<128xf32>
    %132 = vector.multi_reduction <add>, %129, %cst_64 [0] : vector<8x128xf32> to vector<128xf32>
    %133 = vector.shape_cast %132 : vector<128xf32> to vector<1x128xf32>
    %134 = arith.mulf %129, %129 : vector<8x128xf32>
    %cst_65 = arith.constant dense<0.000000e+00> : vector<128xf32>
    %135 = vector.multi_reduction <add>, %134, %cst_65 [0] : vector<8x128xf32> to vector<128xf32>
    %136 = vector.shape_cast %135 : vector<128xf32> to vector<1x128xf32>
    %cst_66 = arith.constant 1.250000e-01 : f32
    %137 = vector.broadcast %cst_66 : f32 to vector<1x128xf32>
    %138 = arith.mulf %133, %137 : vector<1x128xf32>
    %cst_67 = arith.constant 1.250000e-01 : f32
    %139 = vector.broadcast %cst_67 : f32 to vector<1x128xf32>
    %140 = arith.mulf %136, %139 : vector<1x128xf32>
    %141 = arith.mulf %138, %138 : vector<1x128xf32>
    %142 = arith.subf %140, %141 : vector<1x128xf32>
    %cst_68 = arith.constant 0.000000e+00 : f32
    %143 = vector.broadcast %cst_68 : f32 to vector<1x128xf32>
    %144 = arith.maximumf %142, %143 : vector<1x128xf32>
    %145 = vector.broadcast %138 : vector<1x128xf32> to vector<8x128xf32>
    %146 = arith.subf %129, %145 : vector<8x128xf32>
    %cst_69 = arith.constant 9.99999974E-6 : f32
    %147 = vector.broadcast %cst_69 : f32 to vector<1x128xf32>
    %148 = arith.addf %144, %147 : vector<1x128xf32>
    %149 = math.rsqrt %148 : vector<1x128xf32>
    %150 = vector.broadcast %149 : vector<1x128xf32> to vector<8x128xf32>
    %151 = arith.mulf %146, %150 : vector<8x128xf32>
    %152 = vector.broadcast %130 : vector<1x128xf32> to vector<8x128xf32>
    %153 = arith.mulf %151, %152 : vector<8x128xf32>
    %154 = vector.broadcast %131 : vector<1x128xf32> to vector<8x128xf32>
    %155 = arith.addf %153, %154 : vector<8x128xf32>
    %cst_70 = arith.constant 0.000000e+00 : f32
    %156 = vector.broadcast %cst_70 : f32 to vector<8x128xf32>
    %157 = arith.maximumf %155, %156 : vector<8x128xf32>
    %c0_71 = arith.constant 0 : index
    %c0_72 = arith.constant 0 : index
    %158 = vector.load %arg12[%c0_71, %c0_72] : memref<128x128xf32, #tpu.memory_space<vmem>>, vector<128x128xf32>
    %cst_73 = arith.constant dense<0.000000e+00> : vector<8x128xf32>
    %159 = tpu.matmul %157, %158, %cst_73 {dimension_numbers = #tpu.dot_dimension_numbers<[1], [0], [0], [1], [0, 0, 1, 1], [], []>} : vector<8x128xf32>, vector<128x128xf32>, vector<8x128xf32> -> vector<8x128xf32>
    %c13 = arith.constant 13 : index
    %c0_74 = arith.constant 0 : index
    %160 = vector.load %arg4[%c13, %c0_74] : memref<18x128xf32, #tpu.memory_space<vmem>>, vector<1x128xf32>
    %161 = vector.broadcast %160 : vector<1x128xf32> to vector<8x128xf32>
    %162 = arith.addf %159, %161 : vector<8x128xf32>
    %cst_75 = arith.constant dense<0xFF800000> : vector<8xf32>
    %163 = vector.multi_reduction <maximumf>, %162, %cst_75 [1] : vector<8x128xf32> to vector<8xf32>
    %164 = vector.shape_cast %163 : vector<8xf32> to vector<8x1xf32>
    %165 = vector.broadcast %164 : vector<8x1xf32> to vector<8x128xf32>
    %166 = arith.subf %162, %165 : vector<8x128xf32>
    %167 = math.exp %166 : vector<8x128xf32>
    %cst_76 = arith.constant dense<0.000000e+00> : vector<8xf32>
    %168 = vector.multi_reduction <add>, %167, %cst_76 [1] : vector<8x128xf32> to vector<8xf32>
    %169 = vector.shape_cast %168 : vector<8xf32> to vector<8x1xf32>
    %170 = tpu.reciprocal %169 : vector<8x1xf32> -> vector<8x1xf32>
    %171 = vector.broadcast %170 : vector<8x1xf32> to vector<8x128xf32>
    %172 = arith.mulf %167, %171 : vector<8x128xf32>
    %c0_77 = arith.constant 0 : index
    %c0_78 = arith.constant 0 : index
    %173 = vector.load %arg15[%c0_77, %c0_78] : memref<8x128xf32, #tpu.memory_space<vmem>>, vector<8x128xf32>
    tpu.vector_store %arg15[%c0_77, %c0_78], %172 {strides = array<i32>} : memref<8x128xf32, #tpu.memory_space<vmem>>, vector<8x128xf32>,
    %c0_79 = arith.constant 0 : index
    %c0_80 = arith.constant 0 : index
    %174 = vector.load %arg13[%c0_79, %c0_80] : memref<8x128xf32, #tpu.memory_space<vmem>>, vector<8x128xf32>
    %cst_81 = arith.constant dense<0.000000e+00> : vector<8x128xf32>
    %175 = tpu.matmul %49, %174, %cst_81 {dimension_numbers = #tpu.dot_dimension_numbers<[1], [0], [0], [1], [0, 0, 1, 1], [], []>} : vector<8x8xf32>, vector<8x128xf32>, vector<8x128xf32> -> vector<8x128xf32>
    %c14 = arith.constant 14 : index
    %c0_82 = arith.constant 0 : index
    %176 = vector.load %arg4[%c14, %c0_82] : memref<18x128xf32, #tpu.memory_space<vmem>>, vector<1x128xf32>
    %177 = vector.broadcast %176 : vector<1x128xf32> to vector<8x128xf32>
    %178 = arith.addf %175, %177 : vector<8x128xf32>
    %c15 = arith.constant 15 : index
    %c0_83 = arith.constant 0 : index
    %179 = vector.load %arg4[%c15, %c0_83] : memref<18x128xf32, #tpu.memory_space<vmem>>, vector<1x128xf32>
    %c16 = arith.constant 16 : index
    %c0_84 = arith.constant 0 : index
    %180 = vector.load %arg4[%c16, %c0_84] : memref<18x128xf32, #tpu.memory_space<vmem>>, vector<1x128xf32>
    %cst_85 = arith.constant dense<0.000000e+00> : vector<128xf32>
    %181 = vector.multi_reduction <add>, %178, %cst_85 [0] : vector<8x128xf32> to vector<128xf32>
    %182 = vector.shape_cast %181 : vector<128xf32> to vector<1x128xf32>
    %183 = arith.mulf %178, %178 : vector<8x128xf32>
    %cst_86 = arith.constant dense<0.000000e+00> : vector<128xf32>
    %184 = vector.multi_reduction <add>, %183, %cst_86 [0] : vector<8x128xf32> to vector<128xf32>
    %185 = vector.shape_cast %184 : vector<128xf32> to vector<1x128xf32>
    %cst_87 = arith.constant 1.250000e-01 : f32
    %186 = vector.broadcast %cst_87 : f32 to vector<1x128xf32>
    %187 = arith.mulf %182, %186 : vector<1x128xf32>
    %cst_88 = arith.constant 1.250000e-01 : f32
    %188 = vector.broadcast %cst_88 : f32 to vector<1x128xf32>
    %189 = arith.mulf %185, %188 : vector<1x128xf32>
    %190 = arith.mulf %187, %187 : vector<1x128xf32>
    %191 = arith.subf %189, %190 : vector<1x128xf32>
    %cst_89 = arith.constant 0.000000e+00 : f32
    %192 = vector.broadcast %cst_89 : f32 to vector<1x128xf32>
    %193 = arith.maximumf %191, %192 : vector<1x128xf32>
    %194 = vector.broadcast %187 : vector<1x128xf32> to vector<8x128xf32>
    %195 = arith.subf %178, %194 : vector<8x128xf32>
    %cst_90 = arith.constant 9.99999974E-6 : f32
    %196 = vector.broadcast %cst_90 : f32 to vector<1x128xf32>
    %197 = arith.addf %193, %196 : vector<1x128xf32>
    %198 = math.rsqrt %197 : vector<1x128xf32>
    %199 = vector.broadcast %198 : vector<1x128xf32> to vector<8x128xf32>
    %200 = arith.mulf %195, %199 : vector<8x128xf32>
    %201 = vector.broadcast %179 : vector<1x128xf32> to vector<8x128xf32>
    %202 = arith.mulf %200, %201 : vector<8x128xf32>
    %203 = vector.broadcast %180 : vector<1x128xf32> to vector<8x128xf32>
    %204 = arith.addf %202, %203 : vector<8x128xf32>
    %cst_91 = arith.constant 0.000000e+00 : f32
    %205 = vector.broadcast %cst_91 : f32 to vector<8x128xf32>
    %206 = arith.maximumf %204, %205 : vector<8x128xf32>
    %c0_92 = arith.constant 0 : index
    %c0_93 = arith.constant 0 : index
    %207 = vector.load %arg14[%c0_92, %c0_93] : memref<128x128xf32, #tpu.memory_space<vmem>>, vector<128x128xf32>
    %cst_94 = arith.constant dense<0.000000e+00> : vector<8x128xf32>
    %208 = tpu.matmul %206, %207, %cst_94 {dimension_numbers = #tpu.dot_dimension_numbers<[1], [0], [0], [1], [0, 0, 1, 1], [], []>} : vector<8x128xf32>, vector<128x128xf32>, vector<8x128xf32> -> vector<8x128xf32>
    %c17 = arith.constant 17 : index
    %c0_95 = arith.constant 0 : index
    %209 = vector.load %arg4[%c17, %c0_95] : memref<18x128xf32, #tpu.memory_space<vmem>>, vector<1x128xf32>
    %210 = vector.broadcast %209 : vector<1x128xf32> to vector<8x128xf32>
    %211 = arith.addf %208, %210 : vector<8x128xf32>
    %cst_96 = arith.constant dense<0xFF800000> : vector<8xf32>
    %212 = vector.multi_reduction <maximumf>, %211, %cst_96 [1] : vector<8x128xf32> to vector<8xf32>
    %213 = vector.shape_cast %212 : vector<8xf32> to vector<8x1xf32>
    %214 = vector.broadcast %213 : vector<8x1xf32> to vector<8x128xf32>
    %215 = arith.subf %211, %214 : vector<8x128xf32>
    %216 = math.exp %215 : vector<8x128xf32>
    %cst_97 = arith.constant dense<0.000000e+00> : vector<8xf32>
    %217 = vector.multi_reduction <add>, %216, %cst_97 [1] : vector<8x128xf32> to vector<8xf32>
    %218 = vector.shape_cast %217 : vector<8xf32> to vector<8x1xf32>
    %219 = tpu.reciprocal %218 : vector<8x1xf32> -> vector<8x1xf32>
    %220 = vector.broadcast %219 : vector<8x1xf32> to vector<8x128xf32>
    %221 = arith.mulf %216, %220 : vector<8x128xf32>
    %c0_98 = arith.constant 0 : index
    %c0_99 = arith.constant 0 : index
    %222 = vector.load %arg16[%c0_98, %c0_99] : memref<8x128xf32, #tpu.memory_space<vmem>>, vector<8x128xf32>
    tpu.vector_store %arg16[%c0_98, %c0_99], %221 {strides = array<i32>} : memref<8x128xf32, #tpu.memory_space<vmem>>, vector<8x128xf32>,
    %c0_100 = arith.constant 0 : index
    %c0_101 = arith.constant 0 : index
    %223 = vector.load %arg18[%c0_100, %c0_101] : memref<8x128xf32, #tpu.memory_space<vmem>>, vector<8x128xf32>
    tpu.vector_store %arg18[%c0_100, %c0_101], %41 {strides = array<i32>} : memref<8x128xf32, #tpu.memory_space<vmem>>, vector<8x128xf32>,
    %c0_102 = arith.constant 0 : index
    %c64 = arith.constant 64 : index
    %224 = vector.load %arg18[%c0_102, %c64] : memref<8x128xf32, #tpu.memory_space<vmem>>, vector<8x32xf32>
    tpu.vector_store %arg18[%c0_102, %c64], %48 {strides = array<i32>} : memref<8x128xf32, #tpu.memory_space<vmem>>, vector<8x32xf32>,
    return
  }
}

</mosaic_0001>

<bundles_post_ra>
// kernel: model_forward.1
= control target key start
LH: loop header
LB: loop body
LE: loop exit
PB: predicated region body
PF: predicated region fallthrough
CT: control target
= control target key end

     0   :  { %s2313_s0 = inlined_call_operand.vmem [shape: f32[8,16], index: 0, kind: input, shape index: {}]   ;;  %s2314_s1 = inlined_call_operand.vmem [shape: f32[8,128], index: 1, kind: input, shape index: {}]   ;;  %s2315_s2 = inlined_call_operand.vmem [shape: f32[8,128], index: 2, kind: input, shape index: {}]   ;;  %s2316_s3 = inlined_call_operand.hbm [shape: f32[8,32], index: 3, kind: input, shape index: {}]   ;;  %s2317_s4 = inlined_call_operand.vmem [shape: f32[18,128], index: 4, kind: input, shape index: {}]   ;;  %s2318_s5 = inlined_call_operand.vmem [shape: f32[16,128], index: 5, kind: input, shape index: {}]   ;;  %s2319_s6 = inlined_call_operand.vmem [shape: f32[128,128], index: 6, kind: input, shape index: {}]   ;;  %s2320_s7 = inlined_call_operand.vmem [shape: f32[32,128], index: 7, kind: input, shape index: {}]   ;;  %s2321_s8 = inlined_call_operand.hbm [shape: f32[128,128], index: 8, kind: input, shape index: {}]   ;;  %s2322_s9 = inlined_call_operand.hbm [shape: f32[1,128], index: 9, kind: input, shape index: {}]   ;;  %s2323_s10 = inlined_call_operand.vmem [shape: f32[32,128], index: 10, kind: input, shape index: {}]   ;;  %s2324_s11 = inlined_call_operand.hbm [shape: f32[128,128], index: 11, kind: input, shape index: {}]   ;;  %s2325_s12 = inlined_call_operand.hbm [shape: f32[128,128], index: 12, kind: input, shape index: {}]   ;;  %s2326_s13 = inlined_call_operand.hbm [shape: f32[8,128], index: 13, kind: input, shape index: {}]   ;;  %s2327_s14 = inlined_call_operand.hbm [shape: f32[128,128], index: 14, kind: input, shape index: {}]   ;;  %s2328_s15 = inlined_call_operand.vmem [shape: f32[8,128], index: 15, kind: output, shape index: {0}]   ;;  %s2329_s16 = inlined_call_operand.vmem [shape: f32[8,128], index: 16, kind: output, shape index: {1}]   ;;  %s2330_s17 = inlined_call_operand.hbm [shape: f32[8,128], index: 17, kind: output, shape index: {2}]   ;;  %s2331_s18 = inlined_call_operand.vmem [shape: f32[8,128], index: 18, kind: output, shape index: {3}]  }
   0x1   :  { %2332 = sst [smem:[#allocation20_spill]] %s2313_s0 }
   0x2   :  { %2333 = sst [smem:[#allocation21_spill]] %s2314_s1 }
   0x3   :  { %2334 = sst [smem:[#allocation22_spill]] %s2315_s2 }
   0x4   :  { %2335 = sst [smem:[#allocation23_spill]] %s2329_s16 }
   0x5   :  { %24 = vsyncpa [#allocation3], 0 }
   0x6   :  { %25 = vsyncpa [#allocation6], 0 }
   0x7   :  { %26 = vsyncpa [#allocation9], 0 }
   0x8   :  { %27 = vsyncpa [#allocation12], 0 }
   0x9   :  { %28 = vsyncpa [#allocation4], 0  ;;  %s1864_s27 = smov [#allocation5]   ;;  %s1678_s0 = scalar_lea.hbm %s2321_s8, 2048 }
   0xa   :  { %s58_s28 = sshll.u32 %s1864_s27, 4  ;;  %p1679_p0 = scmp.ne.s32.totalorder %s2321_s8, %s1678_s0  ;;  %s59_s28 = int_to_ptr.vmem [resolvable:$true] %s58_s28 }
   0xb   :  { %p1682_p1 = scmp.lt.u32.totalorder %s1678_s0, %s2321_s8 }
   0xd   :  { %p1684_p2 = pnand %p1682_p1, %p1679_p0 }
   0xf   :  { %1687 = shalt.err (!%p1684_p2)
}
  0x10   :  { %s1688_s22 = scalar_lea.vmem %s59_s28, 2048  ;;  %p1693_p4 = scmp.lt.s32.totalorder %s59_s28, %s59_s28 }
  0x11   :  { %p1689_p3 = scmp.ne.s32.totalorder %s59_s28, %s1688_s22  ;;  %p1694_p5 = scmp.lt.s32.totalorder %s1688_s22, %s1688_s22 }
  0x13   :  { %p1695_p6 = por %p1694_p5, %p1693_p4 }
  0x15   :  { %p1696_p7 = pnand %p1695_p6, %p1689_p3 }
  0x17   :  { %1699 = shalt.err (!%p1696_p7)
}
  0x18   :  { %s1865_s2 = smov 128   ;;  %s1866_s23 = smov 8  }
  0x19   :  { %64 = dma.hbm_to_vmem [thread:$0]  %s2321_s8, 2048, %s59_s28, [#allocation6], %s1865_s2, %s1865_s2, %s1866_s23  }
  0x1a   :  { %s1867_s26 = smov [#allocation8]   ;;  %s1868_s29 = smov [#allocation11]  }
  0x1b   :  { %s82_s27 = sshll.u32 %s1867_s26, 4  ;;  %s107_s30 = sshll.u32 %s1868_s29, 4  ;;  %s83_s27 = int_to_ptr.vmem [resolvable:$true] %s82_s27  ;;  %s108_s30 = int_to_ptr.vmem [resolvable:$true] %s107_s30 }
  0x1c   :  { %s1700_s1 = scalar_lea.hbm %s2324_s11, 2048 }
  0x1d   :  { %p1701_p8 = scmp.ne.s32.totalorder %s2324_s11, %s1700_s1  ;;  %p1704_p9 = scmp.lt.u32.totalorder %s1700_s1, %s2324_s11 }
  0x1f   :  { %p1706_p10 = pnand %p1704_p9, %p1701_p8 }
  0x21   :  { %1709 = shalt.err (!%p1706_p10)
}
  0x22   :  { %s1710_s8 = scalar_lea.vmem %s83_s27, 2048  ;;  %p1715_p12 = scmp.lt.s32.totalorder %s83_s27, %s83_s27 }
  0x23   :  { %p1711_p11 = scmp.ne.s32.totalorder %s83_s27, %s1710_s8  ;;  %p1716_p13 = scmp.lt.s32.totalorder %s1710_s8, %s1710_s8 }
  0x25   :  { %p1717_p0 = por %p1716_p13, %p1715_p12 }
  0x27   :  { %p1718_p1 = pnand %p1717_p0, %p1711_p11 }
  0x29   :  { %1721 = shalt.err (!%p1718_p1)
}
  0x2a   :  { %88 = dma.hbm_to_vmem [thread:$0]  %s2324_s11, 2048, %s83_s27, [#allocation9], %s1865_s2, %s1865_s2, %s1866_s23  }
  0x2b   :  { %s1722_s26 = scalar_lea.hbm %s2326_s13, 128 }
  0x2c   :  { %p1723_p2 = scmp.ne.s32.totalorder %s2326_s13, %s1722_s26  ;;  %p1726_p3 = scmp.lt.u32.totalorder %s1722_s26, %s2326_s13 }
  0x2e   :  { %p1728_p4 = pnand %p1726_p3, %p1723_p2 }
  0x30   :  { %1731 = shalt.err (!%p1728_p4)
}
  0x31   :  { %s1732_s20 = scalar_lea.vmem %s108_s30, 128  ;;  %p1737_p6 = scmp.lt.s32.totalorder %s108_s30, %s108_s30 }
  0x32   :  { %p1733_p5 = scmp.ne.s32.totalorder %s108_s30, %s1732_s20  ;;  %p1738_p7 = scmp.lt.s32.totalorder %s1732_s20, %s1732_s20 }
  0x34   :  { %p1739_p8 = por %p1738_p7, %p1737_p6 }
  0x36   :  { %p1740_p9 = pnand %p1739_p8, %p1733_p5 }
  0x38   :  { %1743 = shalt.err (!%p1740_p9)
}
  0x39   :  { %110 = dma.hbm_to_vmem [thread:$0]  %s2326_s13, 128, %s108_s30, [#allocation12]  }
  0x3a   :  { %s1869_s21 = smov [#allocation2]   ;;  %s1870_s8 = smov [#allocation7]  }
  0x3b   :  { %s41_s22 = sshll.u32 %s1869_s21, 4  ;;  %s71_s28 = sshll.u32 %s1870_s8, 4  ;;  %s42_s22 = int_to_ptr.vmem [resolvable:$true] %s41_s22  ;;  %s72_s28 = int_to_ptr.vmem [resolvable:$true] %s71_s28 }
  0x3c   :  { %s1744_s16 = scalar_lea.hbm %s2316_s3, 128 }
  0x3d   :  { %p1745_p10 = scmp.ne.s32.totalorder %s2316_s3, %s1744_s16  ;;  %p1748_p11 = scmp.lt.u32.totalorder %s1744_s16, %s2316_s3 }
  0x3f   :  { %p1750_p12 = pnand %p1748_p11, %p1745_p10 }
  0x41   :  { %1753 = shalt.err (!%p1750_p12)
}
  0x42   :  { %s1754_s13 = scalar_lea.vmem %s42_s22, 128  ;;  %p1759_p0 = scmp.lt.s32.totalorder %s42_s22, %s42_s22 }
  0x43   :  { %p1755_p13 = scmp.ne.s32.totalorder %s42_s22, %s1754_s13  ;;  %p1760_p1 = scmp.lt.s32.totalorder %s1754_s13, %s1754_s13 }
  0x45   :  { %p1761_p2 = por %p1760_p1, %p1759_p0 }
  0x47   :  { %p1762_p3 = pnand %p1761_p2, %p1755_p13 }
  0x49   :  { %1765 = shalt.err (!%p1762_p3)
}
  0x4a   :  { %44 = dma.hbm_to_vmem [thread:$0]  %s2316_s3, 128, %s42_s22, [#allocation3]  }
  0x4b   :  { %s1766_s27 = scalar_lea.hbm %s2322_s9, 16 }
  0x4c   :  { %p1767_p4 = scmp.ne.s32.totalorder %s2322_s9, %s1766_s27  ;;  %p1770_p5 = scmp.lt.u32.totalorder %s1766_s27, %s2322_s9 }
  0x4e   :  { %p1772_p6 = pnand %p1770_p5, %p1767_p4 }
  0x50   :  { %1775 = shalt.err (!%p1772_p6)
}
  0x51   :  { %s1776_s16 = scalar_lea.vmem %s72_s28, 16  ;;  %s1780_s26 = scalar_lea.vmem %s72_s28, 32 }
  0x52   :  { %p1777_p7 = scmp.ne.s32.totalorder %s72_s28, %s1776_s16  ;;  %p1781_p8 = scmp.lt.s32.totalorder %s72_s28, %s72_s28 }
  0x53   :  { %p1782_p9 = scmp.lt.s32.totalorder %s1780_s26, %s1776_s16 }
  0x55   :  { %p1783_p10 = por %p1782_p9, %p1781_p8 }
  0x57   :  { %p1784_p11 = pnand %p1783_p10, %p1777_p7 }
  0x59   :  { %1787 = shalt.err (!%p1784_p11)
}
  0x5a   :  { %74 = dma.hbm_to_vmem [thread:$0]  %s2322_s9, 16, %s72_s28, [#allocation6]  }
  0x5b   :  { %s1871_s29 = smov [#allocation10]   ;;  %s1872_s19 = smov [#allocation13]  }
  0x5c   :  { %s94_s0 = sshll.u32 %s1871_s29, 4  ;;  %s116_s13 = sshll.u32 %s1872_s19, 4  ;;  %s95_s0 = int_to_ptr.vmem [resolvable:$true] %s94_s0  ;;  %s117_s13 = int_to_ptr.vmem [resolvable:$true] %s116_s13 }
  0x5d   :  { %s1788_s20 = scalar_lea.hbm %s2325_s12, 2048 }
  0x5e   :  { %p1789_p12 = scmp.ne.s32.totalorder %s2325_s12, %s1788_s20  ;;  %p1792_p13 = scmp.lt.u32.totalorder %s1788_s20, %s2325_s12 }
  0x60   :  { %p1794_p0 = pnand %p1792_p13, %p1789_p12 }
  0x62   :  { %1797 = shalt.err (!%p1794_p0)
}
  0x63   :  { %s1798_s9 = scalar_lea.vmem %s95_s0, 2048  ;;  %p1803_p2 = scmp.lt.s32.totalorder %s95_s0, %s95_s0 }
  0x64   :  { %p1799_p1 = scmp.ne.s32.totalorder %s95_s0, %s1798_s9  ;;  %p1804_p3 = scmp.lt.s32.totalorder %s1798_s9, %s1798_s9 }
  0x66   :  { %p1805_p4 = por %p1804_p3, %p1803_p2 }
  0x68   :  { %p1806_p5 = pnand %p1805_p4, %p1799_p1 }
  0x6a   :  { %1809 = shalt.err (!%p1806_p5)
}
  0x6b   :  { %100 = dma.hbm_to_vmem [thread:$0]  %s2325_s12, 2048, %s95_s0, [#allocation9], %s1865_s2, %s1865_s2, %s1866_s23  }
  0x6c   :  { %s1810_s26 = scalar_lea.hbm %s2327_s14, 2048 }
  0x6d   :  { %p1811_p6 = scmp.ne.s32.totalorder %s2327_s14, %s1810_s26  ;;  %p1814_p7 = scmp.lt.u32.totalorder %s1810_s26, %s2327_s14 }
  0x6f   :  { %p1816_p8 = pnand %p1814_p7, %p1811_p6 }
  0x71   :  { %1819 = shalt.err (!%p1816_p8)
}
  0x72   :  { %s1820_s30 = scalar_lea.vmem %s117_s13, 2048  ;;  %p1825_p10 = scmp.lt.s32.totalorder %s117_s13, %s117_s13 }
  0x73   :  { %p1821_p9 = scmp.ne.s32.totalorder %s117_s13, %s1820_s30  ;;  %p1826_p11 = scmp.lt.s32.totalorder %s1820_s30, %s1820_s30 }
  0x75   :  { %p1827_p12 = por %p1826_p11, %p1825_p10 }
  0x77   :  { %p1828_p13 = pnand %p1827_p12, %p1821_p9 }
  0x79   :  { %1831 = shalt.err (!%p1828_p13)
}
  0x7a   :  { %122 = dma.hbm_to_vmem [thread:$0]  %s2327_s14, 2048, %s117_s13, [#allocation12], %s1865_s2, %s1865_s2, %s1866_s23  }
  0x7b   :  { %1854 = dma.done.wait [#allocation3], 128  }
  0x7c   :  { %1855 = vsyncadd [#allocation3], 4294967168 }
  0x7d   :  { %1856 = dma.done.wait [#allocation6], 2064  }
  0x7e   :  { %1857 = vsyncadd [#allocation6], 4294965232 }
  0x7f   :  { %1858 = dma.done.wait [#allocation9], 4096  }
  0x80   :  { %1859 = vsyncadd [#allocation9], 4294963200 }
  0x81   :  { %1860 = dma.done.wait [#allocation12], 2176  }
  0x82   :  { %1861 = vsyncadd [#allocation12], 4294965120  ;;  %v1873_v0 = vmov 0.0|0.0   ;;  %vm1874_vm0 = vmmov 0   ;;  %v1875_v1 = vmov 0.0   ;;  %v146_v2 = vld [vmem:[%s2318_s5] sm:$0xff] }
  0x83   :  { %1505 = vmatprep.subr.bf16.mxu1 %v1873_v0  ;;  %1300 = vmatprep.mubr.msk.f32.mxu1 %vm1874_vm0, %v1875_v1  ;;  %v147_v3 = vld [vmem:[%s2318_s5 + $0x8] sm:$0xff]  ;;  %s2336_s11 = sld [smem:[#allocation20_spill]]  ;;  %vm149_vm1 = vcmask 130048   ;;  %v264_v6 = vld [vmem:[%s2319_s6] sm:$0xff]  ;;  %v266_v9 = vld [vmem:[%s2319_s6 + $0x10] sm:$0xff]  ;;  %s2337_s3 = sld [smem:[#allocation21_spill]] }
  0x84   :  { %1538 = vmatprep.subr.bf16.mxu0 %v1873_v0  ;;  %1381 = vmatprep.mubr.msk.f32.mxu0 %vm1874_vm0, %v1875_v1  ;;  %v1506_v4 = vpack.c.bf16 %v147_v3, %v146_v2  ;;  %v265_v7 = vld [vmem:[%s2319_s6 + $0x8] sm:$0xff]  ;;  %v267_v10 = vld [vmem:[%s2319_s6 + $0x18] sm:$0xff]  ;;  %v268_v12 = vld [vmem:[%s2319_s6 + $0x20] sm:$0xff]  ;;  %s1876_s5 = smov 96   ;;  %vm369_vm2 = vcmask 261120   ;;  %s1877_s29 = smov 104  }
  0x85   :  { %v1509_v8 = vpack.c.bf16 %v265_v7, %v264_v6  ;;  %v1512_v11 = vpack.c.bf16 %v267_v10, %v266_v9  ;;  %v269_v13 = vld [vmem:[%s2319_s6 + $0x28] sm:$0xff]  ;;  %v270_v15 = vld [vmem:[%s2319_s6 + $0x30] sm:$0xff]  ;;  %v271_v16 = vld [vmem:[%s2319_s6 + $0x38] sm:$0xff]  ;;  %s2338_s19 = sld [smem:[#allocation22_spill]]  ;;  %vm928_vm3 = vcmask 64512   ;;  %s1878_s12 = smov 64  }
  0x86   :  { %1507 = vmatpush3.bf16.msra.mxu1 %v1506_v4  ;;  %v1515_v14 = vpack.c.bf16 %v269_v13, %v268_v12  ;;  %v1518_v17 = vpack.c.bf16 %v271_v16, %v270_v15  ;;  %v272_v18 = vld [vmem:[%s2319_s6 + $0x40] sm:$0xff]  ;;  %v273_v19 = vld [vmem:[%s2319_s6 + $0x48] sm:$0xff]  ;;  %v274_v21 = vld [vmem:[%s2319_s6 + $0x50] sm:$0xff] }
  0x87   :  { %1508 = vmatprep.subr.bf16.mxu1 %v1873_v0  ;;  %v1521_v20 = vpack.c.bf16 %v273_v19, %v272_v18  ;;  %v275_v22 = vld [vmem:[%s2319_s6 + $0x58] sm:$0xff]  ;;  %v276_v24 = vld [vmem:[%s2319_s6 + $0x60] sm:$0xff]  ;;  %v277_v25 = vld [vmem:[%s2319_s6 + $0x68] sm:$0xff] }
  0x88   :  { %v1524_v23 = vpack.c.bf16 %v275_v22, %v274_v21  ;;  %v1527_v26 = vpack.c.bf16 %v277_v25, %v276_v24  ;;  %v278_v27 = vld [vmem:[%s2319_s6 + $0x70] sm:$0xff]  ;;  %v279_v28 = vld [vmem:[%s2319_s6 + $0x78] sm:$0xff]  ;;  %v1174_v32 = vld [vmem:[%s2317_s4] ss:$0 sm:$0xff] }
  0x89   :  { %v144_v5 = vld [vmem:[%s2336_s11] sm:$0xff]  ;;  %v1530_v29 = vpack.c.bf16 %v279_v28, %v278_v27  ;;  %v365_v2 = vld [vmem:[%s2320_s7 + $0x8] sm:$0xff]  ;;  %v367_v9 = vld [vmem:[%s2320_s7 + $0x18] sm:$0xff] }
  0x8a   :  { %1301 = vmatmul.mubr.msk.f32.vlgmr.msra.gmra.mrb[0].mxu1 %vm149_vm1, %v144_v5  ;;  %v148_v30 = vld [vmem:[%s2337_s3] sm:$0xff]  ;;  %v580_v16 = vld [vmem:[%s2323_s10 + $0x8] sm:$0xff]  ;;  %v581_v21 = vld [vmem:[%s2323_s10 + $0x10] sm:$0xff] }
  0x8b   :  { %1335 = vmatprep.mubr.msk.f32.mxu1 %vm1874_vm0, %v1875_v1  ;;  %1510 = vmatpush3.bf16.msra.mxu1 %v1509_v8  ;;  %v1175_v57 = vld [vmem:[%s2317_s4 + $0x1] ss:$0 sm:$0xff]  ;;  %v1176_v59 = vld [vmem:[%s2317_s4 + $0x2] ss:$0 sm:$0xff]  ;;  %v1177_v4 = vld [vmem:[%s2317_s4 + $0x3] ss:$0 sm:$0xff] }
  0x8c   :  { %1511 = vmatprep.subr.bf16.mxu1 %v1873_v0  ;;  %v364_v63 = vld [vmem:[%s2320_s7] sm:$0xff]  ;;  %v366_v8 = vld [vmem:[%s2320_s7 + $0x10] sm:$0xff]  ;;  %v582_v22 = vld [vmem:[%s2323_s10 + $0x18] sm:$0xff] }
  0x8d   :  { %v1533_v3 = vpack.c.bf16 %v365_v2, %v364_v63  ;;  %v579_v15 = vld [vmem:[%s2323_s10] sm:$0xff]  ;;  %v484_v24 = vld [vmem:[#allocation5] sm:$0xff]  ;;  %v485_v25 = vld [vmem:[#allocation5 + $0x8] sm:$0xff] }
  0x8e   :  { %v1563_v19 = vpack.c.bf16 %v580_v16, %v579_v15  ;;  %v486_v27 = vld [vmem:[#allocation5 + $0x10] sm:$0xff]  ;;  %v487_v28 = vld [vmem:[#allocation5 + $0x18] sm:$0xff] }
  0x8f   :  { %1513 = vmatpush3.bf16.msra.mxu1 %v1512_v11  ;;  %v1536_v11 = vpack.c.bf16 %v367_v9, %v366_v8  ;;  %v498_v63 = vld [vmem:[#allocation5 + $0x70] sm:$0xff]  ;;  %v499_v2 = vld [vmem:[#allocation5 + $0x78] sm:$0xff] }
  0x90   :  { %1514 = vmatprep.subr.bf16.mxu1 %v1873_v0  ;;  %v708_v8 = vld [vmem:[#allocation8 + $0x78] sm:$0xff] }
  0x93   :  { %1516 = vmatpush3.bf16.msra.mxu1 %v1515_v14  ;;  %v145_v14 = vld [vmem:[#allocation2] sm:$0xff] }
  0x94   :  { %1517 = vmatprep.subr.bf16.mxu1 %v1873_v0 }
  0x97   :  { %1519 = vmatpush3.bf16.msra.mxu1 %v1518_v17 }
  0x98   :  { %1520 = vmatprep.subr.bf16.mxu1 %v1873_v0 }
  0x9b   :  { %1522 = vmatpush3.bf16.msra.mxu1 %v1521_v20 }
  0x9c   :  { %1523 = vmatprep.subr.bf16.mxu1 %v1873_v0 }
  0x9f   :  { %1525 = vmatpush3.bf16.msra.mxu1 %v1524_v23  ;;  %v1566_v23 = vpack.c.bf16 %v582_v22, %v581_v21 }
  0xa0   :  { %1526 = vmatprep.subr.bf16.mxu1 %v1873_v0 }
  0xa3   :  { %1528 = vmatpush3.bf16.msra.mxu1 %v1527_v26  ;;  %v1539_v26 = vpack.c.bf16 %v485_v25, %v484_v24 }
  0xa4   :  { %1529 = vmatprep.subr.bf16.mxu1 %v1873_v0 }
  0xa5   :  { %1540 = vmatpush3.bf16.msra.mxu0 %v1539_v26 }
  0xa6   :  { %1541 = vmatprep.subr.bf16.mxu0 %v1873_v0 }
  0xa7   :  { %1531 = vmatpush3.bf16.msra.mxu1 %v1530_v29  ;;  %v1542_v29 = vpack.c.bf16 %v487_v28, %v486_v27 }
  0xa8   :  { %1532 = vmatprep.subr.bf16.mxu1 %v1873_v0 }
  0xa9   :  { %1543 = vmatpush3.bf16.msra.mxu0 %v1542_v29 }
  0xaa   :  { %1544 = vmatprep.subr.bf16.mxu0 %v1873_v0 }
 0x15d   :  { %v219_v31 = vpop.f32.mrb[0].mxu1 }
 0x15e   :  { %v220_v33 = vadd.f32 %v219_v31, %v148_v30  ;;  %v1302_v34 = vpop.f32.mrb[1].mxu1  ;;  %v693_v30 = vld [vmem:[#allocation8] sm:$0xff]  ;;  %v694_v31 = vld [vmem:[#allocation8 + $0x8] sm:$0xff] }
 0x15f   :  { %v489_v34 = vld [vmem:[#allocation5 + $0x28] sm:$0xff] }
 0x160   :  { %v228_v35 = vadd.f32 %v1174_v32, %v220_v33  ;;  %v1569_v32 = vpack.c.bf16 %v694_v31, %v693_v30  ;;  %v488_v33 = vld [vmem:[#allocation5 + $0x20] sm:$0xff] }
 0x162   :  { %v231_v36 = vrot.slane %v228_v35, 4  ;;  %v237_v37 = vmul.f32 %v228_v35, %v228_v35 }
 0x164   :  { %v232_v38 = vadd.f32 %v231_v36, %v228_v35  ;;  %v238_v39 = vrot.slane %v237_v37, 4  ;;  %v695_v36 = vld [vmem:[#allocation8 + $0x10] sm:$0xff] }
 0x166   :  { %v233_v40 = vrot.slane %v232_v38, 2  ;;  %v239_v41 = vadd.f32 %v238_v39, %v237_v37  ;;  %v696_v37 = vld [vmem:[#allocation8 + $0x18] sm:$0xff]  ;;  %v490_v39 = vld [vmem:[#allocation5 + $0x30] sm:$0xff] }
 0x168   :  { %v234_v42 = vadd.f32 %v233_v40, %v232_v38  ;;  %v240_v43 = vrot.slane %v239_v41, 2  ;;  %v1572_v38 = vpack.c.bf16 %v696_v37, %v695_v36  ;;  %v491_v40 = vld [vmem:[#allocation5 + $0x38] sm:$0xff] }
 0x16a   :  { %v235_v44 = vrot.slane %v234_v42, 1  ;;  %v241_v45 = vadd.f32 %v240_v43, %v239_v41  ;;  %v1548_v41 = vpack.c.bf16 %v491_v40, %v490_v39  ;;  %v698_v43 = vld [vmem:[#allocation8 + $0x28] sm:$0xff] }
 0x16c   :  { %v236_v46 = vadd.f32 %v235_v44, %v234_v42  ;;  %v242_v47 = vrot.slane %v241_v45, 1  ;;  %v697_v42 = vld [vmem:[#allocation8 + $0x20] sm:$0xff] }
 0x16d   :  { %v1575_v44 = vpack.c.bf16 %v698_v43, %v697_v42 }
 0x16e   :  { %v243_v48 = vadd.f32 %v242_v47, %v241_v45  ;;  %v244_v49 = vmul.f32 0.125, %v236_v46  ;;  %v492_v45 = vld [vmem:[#allocation5 + $0x40] sm:$0xff]  ;;  %v493_v46 = vld [vmem:[#allocation5 + $0x48] sm:$0xff] }
 0x16f   :  { %v1551_v47 = vpack.c.bf16 %v493_v46, %v492_v45 }
 0x170   :  { %v245_v50 = vmul.f32 0.125, %v243_v48  ;;  %v246_v51 = vmul.f32 %v244_v49, %v244_v49  ;;  %v249_v55 = vsub.f32 %v228_v35, %v244_v49  ;;  %v1545_v35 = vpack.c.bf16 %v489_v34, %v488_v33  ;;  %v699_v48 = vld [vmem:[#allocation8 + $0x30] sm:$0xff]  ;;  %v700_v49 = vld [vmem:[#allocation8 + $0x38] sm:$0xff] }
 0x172   :  { %v247_v52 = vsub.f32 %v245_v50, %v246_v51  ;;  %1546 = vmatpush3.bf16.msra.mxu0 %v1545_v35  ;;  %v1578_v50 = vpack.c.bf16 %v700_v49, %v699_v48  ;;  %v494_v51 = vld [vmem:[#allocation5 + $0x50] sm:$0xff] }
 0x173   :  { %1547 = vmatprep.subr.bf16.mxu0 %v1873_v0 }
 0x174   :  { %v248_v53 = vmax.f32 %v247_v52, 0.0  ;;  %v495_v52 = vld [vmem:[#allocation5 + $0x58] sm:$0xff] }
 0x176   :  { %v250_v54 = vadd.f32 1e-05, %v248_v53  ;;  %1549 = vmatpush3.bf16.msra.mxu0 %v1548_v41  ;;  %v1554_v53 = vpack.c.bf16 %v495_v52, %v494_v51 }
 0x177   :  { %1550 = vmatprep.subr.bf16.mxu0 %v1873_v0 }
 0x178   :  { %1656 = vrsqrt.f32 %v250_v54  ;;  %v701_v54 = vld [vmem:[#allocation8 + $0x40] sm:$0xff] }
 0x17a   :  { %1552 = vmatpush3.bf16.msra.mxu0 %v1551_v47 }
 0x17b   :  { %1553 = vmatprep.subr.bf16.mxu0 %v1873_v0 }
 0x17e   :  { %1555 = vmatpush3.bf16.msra.mxu0 %v1554_v53 }
 0x17f   :  { %1556 = vmatprep.subr.bf16.mxu0 %v1873_v0 }
 0x182   :  { %v1657_v56 = vpop.eup %1656 }
 0x183   :  { %v252_v58 = vmul.f32 %v1657_v56, %v249_v55  ;;  %v702_v55 = vld [vmem:[#allocation8 + $0x48] sm:$0xff] }
 0x184   :  { %v1581_v56 = vpack.c.bf16 %v702_v55, %v701_v54 }
 0x185   :  { %v257_v60 = vmul.f32 %v1175_v57, %v252_v58  ;;  %v496_v57 = vld [vmem:[#allocation5 + $0x60] sm:$0xff]  ;;  %v497_v58 = vld [vmem:[#allocation5 + $0x68] sm:$0xff] }
 0x187   :  { %v262_v61 = vadd.f32 %v1176_v59, %v257_v60  ;;  %v1557_v59 = vpack.c.bf16 %v497_v58, %v496_v57  ;;  %v703_v60 = vld [vmem:[#allocation8 + $0x50] sm:$0xff] }
 0x189   :  { %v263_v62 = vmax.f32 %v262_v61, 0.0  ;;  %v704_v61 = vld [vmem:[#allocation8 + $0x58] sm:$0xff]  ;;  %1558 = vmatpush3.bf16.msra.mxu0 %v1557_v59 }
 0x18a   :  { %1559 = vmatprep.subr.bf16.mxu0 %v1873_v0 }
 0x18b   :  { %1336 = vmatmul.mubr.f32.vlgmr.msra.gmra.mrb[2].mxu1 %v263_v62  ;;  %v1584_v62 = vpack.c.bf16 %v704_v61, %v703_v60  ;;  %v1180_v61 = vld [vmem:[%s2317_s4 + $0x5] ss:$0 sm:$0xff] }
 0x18c   :  { %1346 = vmatprep.mubr.msk.f32.mxu1 %vm1874_vm0, %v1875_v1  ;;  %1534 = vmatpush3.bf16.msra.mxu1 %v1533_v3  ;;  %v1560_v3 = vpack.c.bf16 %v499_v2, %v498_v63  ;;  %v1181_v63 = vld [vmem:[%s2317_s4 + $0x6] ss:$0 sm:$0xff] }
 0x18d   :  { %1535 = vmatprep.subr.bf16.mxu1 %v1873_v0 }
 0x18e   :  { %1561 = vmatpush3.bf16.msra.mxu0 %v1560_v3 }
 0x18f   :  { %1592 = vmatprep.subr.bf16.mxu0 %v1873_v0 }
 0x190   :  { %1537 = vmatpush3.bf16.msra.mxu1 %v1536_v11 }
 0x191   :  { %1562 = vmatprep.subr.bf16.mxu1 %v1873_v0 }
 0x25e   :  { %v351_v5 = vpop.f32.mrb[2].mxu1 }
 0x25f   :  { %v352_v6 = vadd.f32 %v1177_v4, %v351_v5  ;;  %v1337_v7 = vpop.f32.mrb[3].mxu1  ;;  %v705_v4 = vld [vmem:[#allocation8 + $0x60] sm:$0xff]  ;;  %v706_v5 = vld [vmem:[#allocation8 + $0x68] sm:$0xff] }
 0x260   :  { %v707_v7 = vld [vmem:[#allocation8 + $0x70] sm:$0xff] }
 0x261   :  { %v355_v10 = vmul.f32 0.5, %v352_v6  ;;  %1137 = vst [vmem:[%s2331_s18] sm:$0xff] %v352_v6  ;;  %v1590_v9 = vpack.c.bf16 %v708_v8, %v707_v7 }
 0x263   :  { %v356_v12 = vmul.f32 1.442695, %v355_v10  ;;  %v368_v10 = vld [vmem:[%s2338_s19] sm:$0xff] }
 0x265   :  { %1658 = vpow2.f32 %v356_v12  ;;  %v1179_v12 = vld [vmem:[%s2317_s4 + $0x4] ss:$0 sm:$0xff] }
 0x26f   :  { %v1659_v13 = vpop.eup %1658 }
 0x270   :  { %359 = vrot.lane.b32.xlu0 %v1659_v13, %s1876_s5 }
 0x2e2   :  { %v360_v17 = vpop.permute.xlu0 %359 }
 0x2e3   :  { %v362_v18 = vmul.f32 %v360_v17, %v145_v14 }
 0x2e5   :  { %v2185_v20 = vadd.f32 %v362_v18, %v352_v6  ;;  %v1587_v6 = vpack.c.bf16 %v706_v5, %v705_v4  ;;  %v1183_v18 = vld [vmem:[%s2317_s4 + $0x7] ss:$0 sm:$0xff] }
 0x2e7   :  { %926 = vrot.lane.b32.xlu0 %v2185_v20, %s1877_s29  ;;  %1347 = vmatmul.mubr.msk.f32.vlgmr.msra.gmra.mrb[4].mxu1 %vm369_vm2, %v2185_v20 }
 0x2e8   :  { %1564 = vmatpush3.bf16.msra.mxu1 %v1563_v19  ;;  %1392 = vmatprep.mubr.msk.f32.mxu1 %vm1874_vm0, %v1875_v1 }
 0x2e9   :  { %1565 = vmatprep.subr.bf16.mxu1 %v1873_v0 }
 0x2ec   :  { %1567 = vmatpush3.bf16.msra.mxu1 %v1566_v23 }
 0x2ed   :  { %1568 = vmatprep.subr.bf16.mxu1 %v1873_v0 }
 0x2ef   :  { %1393 = vmatmul.mubr.msk.f32.vlgmr.msra.gmra.mrb[6].mxu1 %vm369_vm2, %v2185_v20 }
 0x2f0   :  { %1427 = vmatprep.mubr.msk.f32.mxu1 %vm1874_vm0, %v1875_v1  ;;  %1570 = vmatpush3.bf16.msra.mxu1 %v1569_v32 }
 0x2f1   :  { %1571 = vmatprep.subr.bf16.mxu1 %v1873_v0 }
 0x2f4   :  { %1573 = vmatpush3.bf16.msra.mxu1 %v1572_v38 }
 0x2f5   :  { %1574 = vmatprep.subr.bf16.mxu1 %v1873_v0 }
 0x2f8   :  { %1576 = vmatpush3.bf16.msra.mxu1 %v1575_v44 }
 0x2f9   :  { %1577 = vmatprep.subr.bf16.mxu1 %v1873_v0 }
 0x2fc   :  { %1579 = vmatpush3.bf16.msra.mxu1 %v1578_v50 }
 0x2fd   :  { %1580 = vmatprep.subr.bf16.mxu1 %v1873_v0 }
 0x300   :  { %1582 = vmatpush3.bf16.msra.mxu1 %v1581_v56 }
 0x301   :  { %1583 = vmatprep.subr.bf16.mxu1 %v1873_v0 }
 0x304   :  { %1585 = vmatpush3.bf16.msra.mxu1 %v1584_v62 }
 0x305   :  { %1586 = vmatprep.subr.bf16.mxu1 %v1873_v0 }
 0x308   :  { %1588 = vmatpush3.bf16.msra.mxu1 %v1587_v6  ;;  %v1185_v6 = vld [vmem:[%s2317_s4 + $0x8] ss:$0 sm:$0xff] }
 0x309   :  { %1589 = vmatprep.subr.bf16.mxu1 %v1873_v0 }
 0x30c   :  { %1591 = vmatpush3.bf16.msra.mxu1 %v1590_v9  ;;  %v1186_v9 = vld [vmem:[%s2317_s4 + $0x9] ss:$0 sm:$0xff] }
 0x30d   :  { %1465 = vmatprep.subr.mxu1 %v1875_v1 }
 0x3ba   :  { %v439_v11 = vpop.f32.mrb[4].mxu1 }
 0x3bb   :  { %v440_v13 = vadd.f32 %v439_v11, %v368_v10  ;;  %v1348_v14 = vpop.f32.mrb[5].mxu1 }
 0x3bc   :  { %v927_v14 = vpop.permute.xlu0 %926 }
 0x3bd   :  { %v448_v15 = vadd.f32 %v1179_v12, %v440_v13  ;;  %v920_v13 = vld [vmem:[#allocation11] sm:$0xff] }
 0x3bf   :  { %v451_v16 = vrot.slane %v448_v15, 4  ;;  %v457_v17 = vmul.f32 %v448_v15, %v448_v15 }
 0x3c1   :  { %v452_v19 = vadd.f32 %v451_v16, %v448_v15  ;;  %v458_v21 = vrot.slane %v457_v17, 4  ;;  %v820_v16 = vld [vmem:[#allocation10 + $0x8] sm:$0xff] }
 0x3c2   :  { %v654_v22 = vpop.f32.mrb[6].mxu1 }
 0x3c3   :  { %v453_v23 = vrot.slane %v452_v19, 2  ;;  %v459_v24 = vadd.f32 %v458_v21, %v457_v17  ;;  %v655_v25 = vadd.f32 %v1183_v18, %v654_v22  ;;  %v1394_v26 = vpop.f32.mrb[7].mxu1  ;;  %v821_v18 = vld [vmem:[#allocation10 + $0x10] sm:$0xff]  ;;  %v823_v22 = vld [vmem:[#allocation10 + $0x20] sm:$0xff] }
 0x3c4   :  { %v826_v26 = vld [vmem:[#allocation10 + $0x38] sm:$0xff] }
 0x3c5   :  { %v454_v27 = vadd.f32 %v453_v23, %v452_v19  ;;  %v460_v28 = vrot.slane %v459_v24, 2  ;;  %v660_v29 = vrot.slane %v655_v25, 4  ;;  %v666_v30 = vmul.f32 %v655_v25, %v655_v25  ;;  %v822_v19 = vld [vmem:[#allocation10 + $0x18] sm:$0xff]  ;;  %v824_v23 = vld [vmem:[#allocation10 + $0x28] sm:$0xff] }
 0x3c6   :  { %v1596_v21 = vpack.c.bf16 %v822_v19, %v821_v18 }
 0x3c7   :  { %v455_v31 = vrot.slane %v454_v27, 1  ;;  %v461_v32 = vadd.f32 %v460_v28, %v459_v24  ;;  %v661_v33 = vadd.f32 %v660_v29, %v655_v25  ;;  %v667_v34 = vrot.slane %v666_v30, 4  ;;  %v827_v28 = vld [vmem:[#allocation10 + $0x40] sm:$0xff]  ;;  %v828_v29 = vld [vmem:[#allocation10 + $0x48] sm:$0xff] }
 0x3c8   :  { %v1599_v24 = vpack.c.bf16 %v824_v23, %v823_v22 }
 0x3c9   :  { %v462_v35 = vrot.slane %v461_v32, 1  ;;  %v662_v36 = vrot.slane %v661_v33, 2  ;;  %v668_v37 = vadd.f32 %v667_v34, %v666_v30  ;;  %v456_v38 = vadd.f32 %v455_v31, %v454_v27  ;;  %v829_v31 = vld [vmem:[#allocation10 + $0x50] sm:$0xff]  ;;  %v831_v34 = vld [vmem:[#allocation10 + $0x60] sm:$0xff] }
 0x3ca   :  { %v1605_v30 = vpack.c.bf16 %v828_v29, %v827_v28  ;;  %v1188_v29 = vld [vmem:[%s2317_s4 + $0xb] ss:$0 sm:$0xff] }
 0x3cb   :  { %v463_v39 = vadd.f32 %v462_v35, %v461_v32  ;;  %v663_v40 = vadd.f32 %v662_v36, %v661_v33  ;;  %v669_v41 = vrot.slane %v668_v37, 2  ;;  %v464_v42 = vmul.f32 0.125, %v456_v38  ;;  %v830_v32 = vld [vmem:[#allocation10 + $0x58] sm:$0xff]  ;;  %v832_v35 = vld [vmem:[#allocation10 + $0x68] sm:$0xff] }
 0x3cc   :  { %v1608_v33 = vpack.c.bf16 %v830_v32, %v829_v31  ;;  %v1611_v36 = vpack.c.bf16 %v832_v35, %v831_v34  ;;  %v834_v38 = vld [vmem:[#allocation10 + $0x78] sm:$0xff]  ;;  %v1189_v32 = vld [vmem:[%s2317_s4 + $0xc] ss:$0 sm:$0xff]  ;;  %v1036_v34 = vld [vmem:[#allocation13] sm:$0xff] }
 0x3cd   :  { %v465_v43 = vmul.f32 0.125, %v463_v39  ;;  %v664_v44 = vrot.slane %v663_v40, 1  ;;  %v670_v45 = vadd.f32 %v669_v41, %v668_v37  ;;  %v466_v46 = vmul.f32 %v464_v42, %v464_v42  ;;  %v833_v37 = vld [vmem:[#allocation10 + $0x70] sm:$0xff] }
 0x3ce   :  { %v469_v59 = vsub.f32 %v448_v15, %v464_v42  ;;  %v819_v15 = vld [vmem:[#allocation10] sm:$0xff]  ;;  %v1614_v39 = vpack.c.bf16 %v834_v38, %v833_v37  ;;  %v1037_v35 = vld [vmem:[#allocation13 + $0x8] sm:$0xff] }
 0x3cf   :  { %v665_v47 = vadd.f32 %v664_v44, %v663_v40  ;;  %v671_v48 = vrot.slane %v670_v45, 1  ;;  %v467_v49 = vsub.f32 %v465_v43, %v466_v46  ;;  %v1593_v17 = vpack.c.bf16 %v820_v16, %v819_v15  ;;  %v1182_v40 = vld [vmem:[#allocation7] ss:$0 sm:$0xff]  ;;  %v1187_v44 = vld [vmem:[%s2317_s4 + $0xa] ss:$0 sm:$0xff] }
 0x3d0   :  { %v1617_v38 = vpack.c.bf16 %v1037_v35, %v1036_v34 }
 0x3d1   :  { %v672_v50 = vadd.f32 %v671_v48, %v670_v45  ;;  %v673_v51 = vmul.f32 0.125, %v665_v47  ;;  %v468_v52 = vmax.f32 %v467_v49, 0.0  ;;  %v1191_v48 = vld [vmem:[%s2317_s4 + $0xe] ss:$0 sm:$0xff] }
 0x3d3   :  { %v674_v53 = vmul.f32 0.125, %v672_v50  ;;  %v675_v54 = vmul.f32 %v673_v51, %v673_v51  ;;  %v470_v55 = vadd.f32 1e-05, %v468_v52  ;;  %v678_v3 = vsub.f32 %v655_v25, %v673_v51  ;;  %v825_v25 = vld [vmem:[#allocation10 + $0x30] sm:$0xff] }
 0x3d4   :  { %v1602_v27 = vpack.c.bf16 %v826_v26, %v825_v25 }
 0x3d5   :  { %v676_v56 = vsub.f32 %v674_v53, %v675_v54  ;;  %1660 = vrsqrt.f32 %v470_v55 }
 0x3d7   :  { %v677_v57 = vmax.f32 %v676_v56, 0.0 }
 0x3d9   :  { %v679_v58 = vadd.f32 1e-05, %v677_v57 }
 0x3db   :  { %1662 = vrsqrt.f32 %v679_v58 }
 0x3df   :  { %v1661_v60 = vpop.eup %1660 }
 0x3e0   :  { %v472_v62 = vmul.f32 %v1661_v60, %v469_v59 }
 0x3e2   :  { %v477_v2 = vmul.f32 %v1180_v61, %v472_v62 }
 0x3e4   :  { %v482_v4 = vadd.f32 %v1181_v63, %v477_v2 }
 0x3e5   :  { %v1663_v5 = vpop.eup %1662 }
 0x3e6   :  { %v681_v7 = vmul.f32 %v1663_v5, %v678_v3  ;;  %v483_v8 = vmax.f32 %v482_v4, 0.0 }
 0x3e8   :  { %1382 = vmatmul.mubr.f32.vlgmr.msra.gmra.mrb[0].mxu0 %v483_v8  ;;  %v686_v10 = vmul.f32 %v1185_v6, %v681_v7 }
 0x3e9   :  { %1462 = vmatprep.mubr.msk.f32.mxu0 %vm1874_vm0, %v1875_v1  ;;  %1594 = vmatpush3.bf16.msra.mxu0 %v1593_v17 }
 0x3ea   :  { %v691_v11 = vadd.f32 %v1186_v9, %v686_v10  ;;  %1595 = vmatprep.subr.bf16.mxu0 %v1873_v0 }
 0x3ec   :  { %v692_v12 = vmax.f32 %v691_v11, 0.0 }
 0x3ed   :  { %1597 = vmatpush3.bf16.msra.mxu0 %v1596_v21 }
 0x3ee   :  { %1428 = vmatmul.mubr.f32.vlgmr.msra.gmra.mrb[8].mxu1 %v692_v12  ;;  %1598 = vmatprep.subr.bf16.mxu0 %v1873_v0 }
 0x3ef   :  { %1466 = vmatpush3.msra.mxu1 %v920_v13  ;;  %1467 = vmatprep.mubr.msk.f32.mxu1 %vm1874_vm0, %v1875_v1 }
 0x3f1   :  { %1600 = vmatpush3.bf16.msra.mxu0 %v1599_v24 }
 0x3f2   :  { %1468 = vmatmul.mubr.msk.f32.vlgmr.msra.gmra.mrb[10].mxu1 %vm928_vm3, %v927_v14  ;;  %1601 = vmatprep.subr.bf16.mxu0 %v1873_v0 }
 0x3f5   :  { %1603 = vmatpush3.bf16.msra.mxu0 %v1602_v27 }
 0x3f6   :  { %1604 = vmatprep.subr.bf16.mxu0 %v1873_v0 }
 0x3f9   :  { %1606 = vmatpush3.bf16.msra.mxu0 %v1605_v30 }
 0x3fa   :  { %1607 = vmatprep.subr.bf16.mxu0 %v1873_v0 }
 0x3fd   :  { %1609 = vmatpush3.bf16.msra.mxu0 %v1608_v33 }
 0x3fe   :  { %1610 = vmatprep.subr.bf16.mxu0 %v1873_v0 }
 0x401   :  { %1612 = vmatpush3.bf16.msra.mxu0 %v1611_v36 }
 0x402   :  { %1613 = vmatprep.subr.bf16.mxu0 %v1873_v0 }
 0x405   :  { %1615 = vmatpush3.bf16.msra.mxu0 %v1614_v39 }
 0x406   :  { %1616 = vmatprep.subr.bf16.mxu0 %v1873_v0 }
 0x4bb   :  { %v573_v41 = vpop.f32.mrb[0].mxu0 }
 0x4bc   :  { %v574_v42 = vadd.f32 %v1182_v40, %v573_v41  ;;  %v1383_v43 = vpop.f32.mrb[1].mxu0  ;;  %v1038_v40 = vld [vmem:[#allocation13 + $0x10] sm:$0xff]  ;;  %v1039_v41 = vld [vmem:[#allocation13 + $0x18] sm:$0xff] }
 0x4bd   :  { %v1620_v43 = vpack.c.bf16 %v1039_v41, %v1038_v40 }
 0x4be   :  { %1664 = vtanh.f32 %v574_v42 }
 0x4c1   :  { %v780_v45 = vpop.f32.mrb[8].mxu1 }
 0x4c2   :  { %v781_v46 = vadd.f32 %v1187_v44, %v780_v45  ;;  %v1429_v47 = vpop.f32.mrb[9].mxu1  ;;  %v1040_v44 = vld [vmem:[#allocation13 + $0x20] sm:$0xff]  ;;  %v1041_v45 = vld [vmem:[#allocation13 + $0x28] sm:$0xff] }
 0x4c3   :  { %v1042_v47 = vld [vmem:[#allocation13 + $0x30] sm:$0xff] }
 0x4c4   :  { %v786_v49 = vrot.slane %v781_v46, 4  ;;  %v792_v50 = vmul.f32 %v781_v46, %v781_v46 }
 0x4c5   :  { %v997_v51 = vpop.f32.mrb[10].mxu1 }
 0x4c6   :  { %v787_v52 = vadd.f32 %v786_v49, %v781_v46  ;;  %v793_v53 = vrot.slane %v792_v50, 4  ;;  %v2257_v54 = vadd.f32 %v1191_v48, %v997_v51  ;;  %v1469_v55 = vpop.f32.mrb[11].mxu1  ;;  %v1043_v48 = vld [vmem:[#allocation13 + $0x38] sm:$0xff]  ;;  %v1045_v51 = vld [vmem:[#allocation13 + $0x48] sm:$0xff] }
 0x4c7   :  { %v1626_v49 = vpack.c.bf16 %v1043_v48, %v1042_v47 }
 0x4c8   :  { %v1665_v56 = vpop.eup %1664  ;;  %v788_v57 = vrot.slane %v787_v52, 2  ;;  %v794_v58 = vadd.f32 %v793_v53, %v792_v50  ;;  %v1003_v59 = vrot.slane %v2257_v54, 4  ;;  %v1009_v60 = vmul.f32 %v2257_v54, %v2257_v54  ;;  %v1044_v50 = vld [vmem:[#allocation13 + $0x40] sm:$0xff]  ;;  %v1047_v53 = vld [vmem:[#allocation13 + $0x58] sm:$0xff] }
 0x4c9   :  { %578 = vst [vmem:[#allocation14] sm:$0xff] %v1665_v56 }
 0x4ca   :  { %v789_v61 = vadd.f32 %v788_v57, %v787_v52  ;;  %v795_v62 = vrot.slane %v794_v58, 2  ;;  %v1004_v63 = vadd.f32 %v1003_v59, %v2257_v54  ;;  %v1010_v2 = vrot.slane %v1009_v60, 4  ;;  %v1048_v59 = vld [vmem:[#allocation13 + $0x60] sm:$0xff] }
 0x4cb   :  { %v1629_v52 = vpack.c.bf16 %v1045_v51, %v1044_v50 }
 0x4cc   :  { %v790_v3 = vrot.slane %v789_v61, 1  ;;  %v796_v4 = vadd.f32 %v795_v62, %v794_v58  ;;  %v1005_v7 = vrot.slane %v1004_v63, 2  ;;  %v1011_v8 = vadd.f32 %v1010_v2, %v1009_v60  ;;  %v1049_v60 = vld [vmem:[#allocation13 + $0x68] sm:$0xff]  ;;  %v1051_v2 = vld [vmem:[#allocation13 + $0x78] sm:$0xff] }
 0x4cd   :  { %v1635_v62 = vpack.c.bf16 %v1049_v60, %v1048_v59 }
 0x4ce   :  { %v791_v5 = vadd.f32 %v790_v3, %v789_v61  ;;  %v797_v6 = vrot.slane %v796_v4, 1  ;;  %v1006_v13 = vadd.f32 %v1005_v7, %v1004_v63  ;;  %v1012_v14 = vrot.slane %v1011_v8, 2  ;;  %v1193_v61 = vld [vmem:[%s2317_s4 + $0xf] ss:$0 sm:$0xff]  ;;  %v1050_v63 = vld [vmem:[#allocation13 + $0x70] sm:$0xff] }
 0x4cf   :  { %v1190_v7 = vld [vmem:[%s2317_s4 + $0xd] ss:$0 sm:$0xff] }
 0x4d0   :  { %v798_v9 = vadd.f32 %v797_v6, %v796_v4  ;;  %v799_v10 = vmul.f32 0.125, %v791_v5  ;;  %v1007_v17 = vrot.slane %v1006_v13, 1  ;;  %v1013_v18 = vadd.f32 %v1012_v14, %v1011_v8 }
 0x4d1   :  { %v1638_v4 = vpack.c.bf16 %v1051_v2, %v1050_v63 }
 0x4d2   :  { %v800_v11 = vmul.f32 0.125, %v798_v9  ;;  %v801_v12 = vmul.f32 %v799_v10, %v799_v10  ;;  %v1008_v21 = vadd.f32 %v1007_v17, %v1006_v13  ;;  %v1014_v22 = vrot.slane %v1013_v18, 1 }
 0x4d3   :  { %v804_v27 = vsub.f32 %v781_v46, %v799_v10  ;;  %v1623_v46 = vpack.c.bf16 %v1041_v45, %v1040_v44 }
 0x4d4   :  { %v802_v15 = vsub.f32 %v800_v11, %v801_v12  ;;  %v1015_v23 = vadd.f32 %v1014_v22, %v1013_v18  ;;  %v1016_v24 = vmul.f32 0.125, %v1008_v21  ;;  %v1195_v11 = vld [vmem:[%s2317_s4 + $0x11] ss:$0 sm:$0xff] }
 0x4d6   :  { %v803_v16 = vmax.f32 %v802_v15, 0.0  ;;  %v1017_v25 = vmul.f32 0.125, %v1015_v23  ;;  %v1018_v26 = vmul.f32 %v1016_v24, %v1016_v24  ;;  %v1021_v56 = vsub.f32 %v2257_v54, %v1016_v24  ;;  %v1194_v54 = vld [vmem:[%s2317_s4 + $0x10] ss:$0 sm:$0xff]  ;;  %s1879_s4 = smov [#allocation14]  }
 0x4d7   :  { %s1153_s0 = sshll.u32 %s1879_s4, 4  ;;  %s1154_s0 = int_to_ptr.vmem [resolvable:$true] %s1153_s0 }
 0x4d8   :  { %v805_v19 = vadd.f32 1e-05, %v803_v16  ;;  %v1019_v31 = vsub.f32 %v1017_v25, %v1018_v26  ;;  %s1832_s14 = scalar_lea.vmem %s1154_s0, 128  ;;  %p1837_p1 = scmp.lt.s32.totalorder %s1154_s0, %s1154_s0 }
 0x4d9   :  { %p1833_p0 = scmp.ne.s32.totalorder %s1154_s0, %s1832_s14  ;;  %p1838_p2 = scmp.lt.s32.totalorder %s1832_s14, %s1832_s14 }
 0x4da   :  { %1666 = vrsqrt.f32 %v805_v19  ;;  %v1020_v37 = vmax.f32 %v1019_v31, 0.0 }
 0x4db   :  { %p1839_p3 = por %p1838_p2, %p1837_p1 }
 0x4dc   :  { %v1022_v42 = vadd.f32 1e-05, %v1020_v37 }
 0x4dd   :  { %p1840_p4 = pnand %p1839_p3, %p1833_p0 }
 0x4de   :  { %1668 = vrsqrt.f32 %v1022_v42 }
 0x4e4   :  { %v1667_v28 = vpop.eup %1666 }
 0x4e5   :  { %v807_v30 = vmul.f32 %v1667_v28, %v804_v27 }
 0x4e7   :  { %v812_v33 = vmul.f32 %v1188_v29, %v807_v30 }
 0x4e8   :  { %v1669_v55 = vpop.eup %1668 }
 0x4e9   :  { %v817_v36 = vadd.f32 %v1189_v32, %v812_v33  ;;  %v1024_v58 = vmul.f32 %v1669_v55, %v1021_v56 }
 0x4eb   :  { %v818_v39 = vmax.f32 %v817_v36, 0.0  ;;  %v1029_v3 = vmul.f32 %v1193_v61, %v1024_v58 }
 0x4ed   :  { %1463 = vmatmul.mubr.f32.vlgmr.msra.gmra.mrb[2].mxu0 %v818_v39  ;;  %v1034_v5 = vadd.f32 %v1194_v54, %v1029_v3 }
 0x4ee   :  { %1618 = vmatpush3.bf16.msra.mxu0 %v1617_v38  ;;  %1502 = vmatprep.mubr.msk.f32.mxu0 %vm1874_vm0, %v1875_v1  ;;  %v1046_v1 = vld [vmem:[#allocation13 + $0x50] sm:$0xff] }
 0x4ef   :  { %1619 = vmatprep.subr.bf16.mxu0 %v1873_v0  ;;  %v1632_v57 = vpack.c.bf16 %v1047_v53, %v1046_v1  ;;  %v1035_v6 = vmax.f32 %v1034_v5, 0.0 }
 0x4f2   :  { %1621 = vmatpush3.bf16.msra.mxu0 %v1620_v43 }
 0x4f3   :  { %1622 = vmatprep.subr.bf16.mxu0 %v1873_v0 }
 0x4f6   :  { %1624 = vmatpush3.bf16.msra.mxu0 %v1623_v46 }
 0x4f7   :  { %1625 = vmatprep.subr.bf16.mxu0 %v1873_v0 }
 0x4fa   :  { %1627 = vmatpush3.bf16.msra.mxu0 %v1626_v49 }
 0x4fb   :  { %1628 = vmatprep.subr.bf16.mxu0 %v1873_v0 }
 0x4fe   :  { %1630 = vmatpush3.bf16.msra.mxu0 %v1629_v52 }
 0x4ff   :  { %1631 = vmatprep.subr.bf16.mxu0 %v1873_v0 }
 0x502   :  { %1633 = vmatpush3.bf16.msra.mxu0 %v1632_v57 }
 0x503   :  { %1634 = vmatprep.subr.bf16.mxu0 %v1873_v0 }
 0x506   :  { %1636 = vmatpush3.bf16.msra.mxu0 %v1635_v62 }
 0x507   :  { %1637 = vmatprep.subr.bf16.mxu0 %v1873_v0 }
 0x50a   :  { %1639 = vmatpush3.bf16.msra.mxu0 %v1638_v4 }
 0x50d   :  { %1503 = vmatmul.mubr.f32.vlgmr.msra.gmra.mrb[4].mxu0 %v1035_v6 }
 0x5c0   :  { %v906_v8 = vpop.f32.mrb[2].mxu0 }
 0x5c1   :  { %v907_v9 = vadd.f32 %v1190_v7, %v906_v8  ;;  %v1464_v10 = vpop.f32.mrb[3].mxu0 }
 0x5c3   :  { %910 = vmax.xlane.f32.xlu1 %v907_v9 }
 0x5e0   :  { %v1123_v12 = vpop.f32.mrb[4].mxu0 }
 0x5e1   :  { %v1124_v13 = vadd.f32 %v1195_v11, %v1123_v12  ;;  %v1504_v14 = vpop.f32.mrb[5].mxu0 }
 0x5e3   :  { %1127 = vmax.xlane.f32.xlu1 %v1124_v13 }
 0x650   :  { %v911_v0 = vpop.xlane.xlu1 %910 }
 0x651   :  { %v912_v15 = vsub.f32 %v907_v9, %v911_v0 }
 0x653   :  { %v913_v16 = vmul.f32 1.442695, %v912_v15 }
 0x655   :  { %1670 = vpow2.f32 %v913_v16 }
 0x65f   :  { %v1671_v17 = vpop.eup %1670 }
 0x660   :  { %915 = vadd.xlane.f32.xlu0 %v1671_v17 }
 0x670   :  { %v1128_v18 = vpop.xlane.xlu1 %1127 }
 0x671   :  { %v1129_v19 = vsub.f32 %v1124_v13, %v1128_v18 }
 0x673   :  { %v1130_v21 = vmul.f32 1.442695, %v1129_v19 }
 0x675   :  { %1672 = vpow2.f32 %v1130_v21 }
 0x67f   :  { %v1673_v22 = vpop.eup %1672 }
 0x680   :  { %1132 = vadd.xlane.f32.xlu1 %v1673_v22 }
 0x691   :  { %1138 = vrot.lane.b32.xlu1 %v2185_v20, %s1878_s12 }
 0x692   :  { %1843 = shalt.err (!%p1840_p4)
}
 0x693   :  { %s1844_s13 = scalar_lea.hbm %s2330_s17, 128 }
 0x694   :  { %p1845_p5 = scmp.ne.s32.totalorder %s2330_s17, %s1844_s13  ;;  %p1848_p6 = scmp.lt.u32.totalorder %s1844_s13, %s2330_s17 }
 0x696   :  { %p1850_p7 = pnand %p1848_p6, %p1845_p5 }
 0x698   :  { %1853 = shalt.err (!%p1850_p7)
}
 0x699   :  { %1156 = dma.vmem_to_hbm [thread:$0]  %s1154_s0, 128, %s2330_s17, [#allocation4]   ;;  %vm1141_vm4 = vcmask 785920  }
 0x69a   :  { %s2339_s25 = sld [smem:[#allocation23_spill]] }
 0x6ed   :  { %v916_v20 = vpop.xlane.xlu0 %915 }
 0x6ee   :  { %1674 = vrcp.f32 %v916_v20 }
 0x6f8   :  { %v1675_v23 = vpop.eup %1674 }
 0x6f9   :  { %v918_v24 = vmul.f32 %v1675_v23, %v1671_v17 }
 0x6fb   :  { %919 = vst [vmem:[%s2328_s15] sm:$0xff] %v918_v24 }
 0x70d   :  { %v1133_v25 = vpop.xlane.xlu1 %1132 }
 0x70e   :  { %1676 = vrcp.f32 %v1133_v25 }
 0x711   :  { %v1139_v26 = vpop.permute.xlu1 %1138 }
 0x712   :  { %1142 = vst.msk [vmem:[%s2331_s18] sm:$0xff] %vm1141_vm4, %v1139_v26 }
 0x718   :  { %v1677_v27 = vpop.eup %1676 }
 0x719   :  { %v1135_v28 = vmul.f32 %v1677_v27, %v1673_v22 }
 0x71b   :  { %1136 = vst [vmem:[%s2339_s25] sm:$0xff] %v1135_v28 }
 0x71c   :  { %1862 = dma.done.wait [#allocation4], 128  }
 0x71d   :  { %1863 = vsyncadd [#allocation4], 4294967168 }
 0x71e   :  { %1168 = vsyncpa [#allocation3], 1 }
 0x71f   :  { %1169 = vsyncpa [#allocation6], 1 }
 0x720   :  { %1170 = vsyncpa [#allocation9], 1 }
 0x721   :  { %1171 = vsyncpa [#allocation12], 1 }
 0x722   :  { %1172 = vsyncpa [#allocation4], 1 }

</bundles_post_ra>
